<compile_context>
chip_gen: v7x
topology: tpu7x:2x2x1
jax: 0.10.0
libtpu: 0.0.40
codegen_flags: <defaults>
</compile_context>

<pallas_src>
import math
import functools
import numpy as np
import jax
import jax.numpy as jnp
from jax.experimental import pallas as pl
from jax.experimental.pallas import tpu as pltpu


# ----------------------------- shared math helpers ---------------------------------

def gelu_tanh(x):
    # TODO(synk): HF "gelu" is the erf-based exact GELU; the tanh approximation is used
    # here for Mosaic lowering portability (difference is ~1e-3 relative).
    c = math.sqrt(2.0 / math.pi)
    return 0.5 * x * (1.0 + jnp.tanh(c * (x + 0.044715 * x * x * x)))


def layer_norm(x, g, b, eps):
    mu = jnp.mean(x, axis=-1, keepdims=True)
    var = jnp.mean((x - mu) ** 2, axis=-1, keepdims=True)
    return (x - mu) * jax.lax.rsqrt(var + eps) * g + b


def softmax_last(x):
    m = jnp.max(x, axis=-1, keepdims=True)
    e = jnp.exp(x - m)
    return e / jnp.sum(e, axis=-1, keepdims=True)


def encode_scalar_column(x, size=64):
    # fastformer-style sinusoidal encoding of a per-token scalar -> `size` features (glue).
    half = size // 2
    r = jnp.arange(half, dtype=jnp.float32)
    div = jnp.power(10000.0, 2.0 * r / size)
    x = x[..., None].astype(jnp.float32)
    return jnp.concatenate([jnp.sin(x / div), jnp.cos(x / div)], axis=-1)


# ----------------------------------- kernel ----------------------------------------

def _mm(a, w):
    """2-D matmul with f32 accumulation; operand fed in the weight's storage dtype."""
    return jnp.dot(a.astype(w.dtype), w, preferred_element_type=jnp.float32)


def ce_predictor_kernel(h0_ref, amask_ref,
                        wq_ref, bq_ref, wk_ref, bk_ref, wv_ref, bv_ref, wo_ref, bo_ref,
                        ln1g_ref, ln1b_ref, wi_ref, bi_ref, wf_ref, bf_ref,
                        ln2g_ref, ln2b_ref,
                        out_ref, h_ref, ctx_ref,
                        *, num_heads, head_dim, hidden, bt, seq, eps, heads_per_group):
    f32 = jnp.float32
    layer = pl.program_id(1)
    rows = bt * seq

    # Initialize the carried hidden state from the (XLA-side) fused input projection.
    @pl.when(layer == 0)
    def _init():
        h_ref[...] = h0_ref[...].reshape(rows, hidden).astype(f32)

    h = h_ref[...]                                          # (rows, H) f32, carried over l

    # get_extended_attention_mask: (1 - mask) * -10000; the (bt,S,S) broadcast is hoisted
    # out of the head loop (JAX does not CSE broadcast_in_dim).
    ext = (1.0 - amask_ref[...]) * (-10000.0)               # (bt, 1, S)
    ext_b = jnp.broadcast_to(ext, (bt, seq, seq))           # (bt, S, S), once per layer

    # --------------- self-attention (only this layer's weights are resident) --------------
    q = _mm(h, wq_ref[0]) + bq_ref[0]
    k = _mm(h, wk_ref[0]) + bk_ref[0]
    v = _mm(h, wv_ref[0]) + bv_ref[0]
    q3 = q.reshape(bt, seq, hidden)
    k3 = k.reshape(bt, seq, hidden)
    v3 = v.reshape(bt, seq, hidden)

    inv_sqrt_dh = 1.0 / math.sqrt(head_dim)
    hpg = heads_per_group
    # TODO(synk): if bundle dumps show vreg spills at production num_heads=12, convert this
    # static unroll to lax.fori_loop over head groups to bound live ranges.
    for g in range(num_heads // hpg):
        group_ctx = []
        for i in range(hpg):
            hd_idx = g * hpg + i
            sl = slice(hd_idx * head_dim, (hd_idx + 1) * head_dim)
            qh, kh, vh = q3[:, :, sl], k3[:, :, sl], v3[:, :, sl]
            s = jnp.einsum('bqd,bkd->bqk', qh, kh,
                           preferred_element_type=f32) * inv_sqrt_dh + ext_b
            s = s - jnp.max(s, axis=-1, keepdims=True)
            e = jnp.exp(s)
            p = e * pl.reciprocal(jnp.sum(e, axis=-1, keepdims=True), approx=True)
            group_ctx.append(jnp.einsum('bqk,bkd->bqd', p, vh, preferred_element_type=f32))
        # Store a lane-aligned slab (hpg*head_dim wide) -> unmasked full-lane stores, and
        # the output projection below stays a single K=H MXU matmul.
        gsl = slice(g * hpg * head_dim, (g + 1) * hpg * head_dim)
        ctx_ref[:, :, gsl] = (group_ctx[0] if hpg == 1
                              else jnp.concatenate(group_ctx, axis=-1))

    ctx = ctx_ref[...].reshape(rows, hidden)
    attn_out = _mm(ctx, wo_ref[0]) + bo_ref[0]
    h = layer_norm(attn_out + h, ln1g_ref[0], ln1b_ref[0], eps)

    # --------------------------------------- FFN ------------------------------------------
    ff = gelu_tanh(_mm(h, wi_ref[0]) + bi_ref[0])
    h = layer_norm(_mm(ff, wf_ref[0]) + bf_ref[0] + h, ln2g_ref[0], ln2b_ref[0], eps)

    h_ref[...] = h

    # ----------------------- emit the lane-dense hidden state -----------------------------
    @pl.when(layer == pl.num_programs(1) - 1)
    def _emit():
        out_ref[...] = h.reshape(bt, seq, hidden).astype(out_ref.dtype)


# ----------------------------------- wrapper ----------------------------------------

def _vmem_limit_and_target_rows():
    """VMEM-capacity-aware defaults: explicit vmem limit + batch-tile row target."""
    vmem_cap = 64 << 20                      # conservative fallback (v7x per-core VMEM)
    try:
        info = pltpu.get_tpu_info()
        vmem_cap = int(getattr(info, "vmem_capacity_bytes", vmem_cap))
    except Exception:
        pass
    # Leave headroom below physical; cap at 100 MiB (v5e/v6e have 128 MiB physical).
    vmem_limit = int(max(32 << 20, min(vmem_cap - (4 << 20), 100 << 20)))
    # Roofline-ish row targets: high-VMEM parts (v6e) want the biggest tiles (~1024 rows);
    # 64 MiB parts (v7x) and v5e are happy around 512 rows.
    target_rows = 1024 if vmem_cap >= (96 << 20) else 512
    return vmem_limit, target_rows


def ce_predictor_forward(params, masked_embeddings, word_embeddings, model_outputs,
                         mask_ce, attention_mask, *, num_heads, eps=1e-12,
                         batch_tile=None, target_rows=None,
                         matmul_weight_dtype=jnp.bfloat16):
    B, S, in_dims = masked_embeddings.shape
    H = params['w1'].shape[1]
    L = params['wq'].shape[0]
    assert H % num_heads == 0, "hidden size must be divisible by num_heads"
    head_dim = H // num_heads
    wdt = matmul_weight_dtype

    # ---- input projection (in_fc1..4 fused into one matmul) runs in XLA: keeps the fat
    # concatenated activation and its weight out of VMEM for all L layer steps.
    enc = encode_scalar_column(mask_ce)                                   # (B, S, 64) glue
    x = jnp.concatenate([masked_embeddings, word_embeddings, model_outputs, enc],
                        axis=-1).astype(jnp.float32)                      # (B, S, 3*in+64)
    w_in = jnp.concatenate([params['w1'], params['w2'], params['w3'], params['w4']],
                           axis=0).astype(jnp.float32)                    # (3*in+64, H)
    b_in = (params['b1'] + params['b2'] + params['b3'] + params['b4']).astype(jnp.float32)
    h0 = (jnp.dot(x.reshape(B * S, -1), w_in,
                  precision=jax.lax.Precision.HIGHEST).reshape(B, S, H) + b_in)

    amask = attention_mask.astype(jnp.float32).reshape(B, 1, S)

    # Per-layer params; matmul weights in `wdt` (bf16 default), vector params f32 (L,1,D).
    wq = params['wq'].astype(wdt); wk = params['wk'].astype(wdt)
    wv = params['wv'].astype(wdt); wo = params['wo'].astype(wdt)
    wi = params['wi'].astype(wdt); wf = params['wf'].astype(wdt)

    def v3(a):
        return a.astype(jnp.float32).reshape(L, 1, a.shape[-1])

    bq, bk, bv, bo = v3(params['bq']), v3(params['bk']), v3(params['bv']), v3(params['bo'])
    ln1g, ln1b = v3(params['ln1g']), v3(params['ln1b'])
    bi, bf_ = v3(params['bi']), v3(params['bf'])
    ln2g, ln2b = v3(params['ln2g']), v3(params['ln2b'])

    vmem_limit, default_rows = _vmem_limit_and_target_rows()
    if target_rows is None:
        target_rows = default_rows
    if batch_tile is None:
        cands = [d for d in range(1, B + 1) if B % d == 0 and d * S <= target_rows]
        if not cands:
            cands = [1]
        two = [d for d in cands if B // d >= 2]   # keep >= 2 grid steps for megacore
        batch_tile = max(two) if two else max(cands)
    assert B % batch_tile == 0
    n_tiles = B // batch_tile

    # Heads are processed / stored in lane-aligned groups (pairs when head_dim == 64).
    hpg = 1 if head_dim >= 128 else max(1, min(num_heads, 128 // head_dim))
    while num_heads % hpg:
        hpg -= 1

    kernel = functools.partial(ce_predictor_kernel, num_heads=num_heads, head_dim=head_dim,
                               hidden=H, bt=batch_tile, seq=S, eps=eps, heads_per_group=hpg)

    def batch_spec(shape):
        return pl.BlockSpec(shape, lambda b, l: (b, 0, 0))

    def layer_spec(a):                 # stream one layer per inner grid step
        return pl.BlockSpec((1,) + a.shape[1:], lambda b, l: (l, 0, 0))

    in_specs = [batch_spec((batch_tile, S, H)),
                batch_spec((batch_tile, 1, S)),
                layer_spec(wq), layer_spec(bq), layer_spec(wk), layer_spec(bk),
                layer_spec(wv), layer_spec(bv), layer_spec(wo), layer_spec(bo),
                layer_spec(ln1g), layer_spec(ln1b),
                layer_spec(wi), layer_spec(bi), layer_spec(wf), layer_spec(bf_),
                layer_spec(ln2g), layer_spec(ln2b)]

    hidden = pl.pallas_call(
        kernel,
        out_shape=jax.ShapeDtypeStruct((B, S, H), jnp.float32),
        grid=(n_tiles, L),
        in_specs=in_specs,
        out_specs=pl.BlockSpec((batch_tile, S, H), lambda b, l: (b, 0, 0)),
        scratch_shapes=[pltpu.VMEM((batch_tile * S, H), jnp.float32),   # running hidden state
                        pltpu.VMEM((batch_tile, S, H), jnp.float32)],   # head-context slab
        compiler_params=pltpu.CompilerParams(
            dimension_semantics=("parallel", "arbitrary"),
            vmem_limit_bytes=vmem_limit,
        ),
    )(h0, amask, wq, bq, wk, bk, wv, bv, wo, bo,
      ln1g, ln1b, wi, bi, wf, bf_, ln2g, ln2b)

    # out_fc (H -> 1): trivial XLA matmul on the lane-dense kernel output; keeping it out of
    # the kernel avoids an N=1 MXU push and masked 1-lane stores.
    out = jnp.dot(hidden, params['wout'].astype(jnp.float32),
                  precision=jax.lax.Precision.HIGHEST) + params['bout']
    return out[..., 0]                                                    # (B, S)


# --------------------------- deterministic parameter init ---------------------------

def init_params(key, in_dims, hidden, intermediate, num_layers, std=0.01):
    keys = iter(jax.random.split(key, 16))

    def nrm(shape):
        return (std * jax.random.normal(next(keys), shape)).astype(jnp.float32)

    zeros = lambda s: jnp.zeros(s, jnp.float32)
    ones = lambda s: jnp.ones(s, jnp.float32)
    L, H, I = num_layers, hidden, intermediate
    p = {
        'w1': nrm((in_dims, H)), 'b1': zeros((1, H)),
        'w2': nrm((in_dims, H)), 'b2': zeros((1, H)),
        'w3': nrm((in_dims, H)), 'b3': zeros((1, H)),
        'w4': nrm((64, H)),      'b4': zeros((1, H)),
        'wq': nrm((L, H, H)), 'bq': zeros((L, H)),
        'wk': nrm((L, H, H)), 'bk': zeros((L, H)),
        'wv': nrm((L, H, H)), 'bv': zeros((L, H)),
        'wo': nrm((L, H, H)), 'bo': zeros((L, H)),
        'ln1g': ones((L, H)), 'ln1b': zeros((L, H)),
        'wi': nrm((L, H, I)), 'bi': zeros((L, I)),
        'wf': nrm((L, I, H)), 'bf': zeros((L, H)),
        'ln2g': ones((L, H)), 'ln2b': zeros((L, H)),
        'wout': nrm((H, 1)), 'bout': zeros((1, 1)),
    }
    return p


# -------------------------------- pure-JAX reference --------------------------------

def reference_forward(params, me, we, mo, mask_ce, attention_mask, *, num_heads, eps=1e-12):
    with jax.default_matmul_precision("highest"):
        p = params
        enc = encode_scalar_column(mask_ce)
        h = (me @ p['w1'] + p['b1'] + we @ p['w2'] + p['b2']
             + mo @ p['w3'] + p['b3'] + enc @ p['w4'] + p['b4'])
        B, S, H = h.shape
        L = p['wq'].shape[0]
        dh = H // num_heads
        ext = ((1.0 - attention_mask.astype(jnp.float32)) * -10000.0)[:, None, None, :]
        for l in range(L):
            q = h @ p['wq'][l] + p['bq'][l]
            k = h @ p['wk'][l] + p['bk'][l]
            v = h @ p['wv'][l] + p['bv'][l]
            qh = q.reshape(B, S, num_heads, dh).transpose(0, 2, 1, 3)
            kh = k.reshape(B, S, num_heads, dh).transpose(0, 2, 1, 3)
            vh = v.reshape(B, S, num_heads, dh).transpose(0, 2, 1, 3)
            sc = jnp.einsum('bhqd,bhkd->bhqk', qh, kh) / math.sqrt(dh) + ext
            pr = softmax_last(sc)
            ctx = jnp.einsum('bhqk,bhkd->bhqd', pr, vh).transpose(0, 2, 1, 3).reshape(B, S, H)
            attn_out = ctx @ p['wo'][l] + p['bo'][l]
            h = layer_norm(attn_out + h, p['ln1g'][l], p['ln1b'][l], eps)
            ff = gelu_tanh(h @ p['wi'][l] + p['bi'][l])
            ff_out = ff @ p['wf'][l] + p['bf'][l]
            h = layer_norm(ff_out + h, p['ln2g'][l], p['ln2b'][l], eps)
        out = h @ p['wout'] + p['bout']
        return out[..., 0]


# ------------------------------------- main ------------------------------------------

if __name__ == "__main__":
    B, S, IN_DIMS, HIDDEN, INTER, LAYERS, HEADS = 4, 8, 64, 32, 64, 2, 2

    key = jax.random.PRNGKey(0)
    kp, k1, k2, k3, k4, k5 = jax.random.split(key, 6)
    params = init_params(kp, IN_DIMS, HIDDEN, INTER, LAYERS)

    masked_embeddings = jax.random.normal(k1, (B, S, IN_DIMS), jnp.float32)
    word_embeddings = jax.random.normal(k2, (B, S, IN_DIMS), jnp.float32)
    model_outputs = jax.random.normal(k3, (B, S, IN_DIMS), jnp.float32)
    mask_ce = jax.random.uniform(k4, (B, S), jnp.float32)
    attention_mask = (jax.random.uniform(k5, (B, S)) > 0.2).astype(jnp.float32)

    ref = reference_forward(params, masked_embeddings, word_embeddings, model_outputs,
                            mask_ce, attention_mask, num_heads=HEADS)

    # f32-weight run: tight parity with the f32 reference.
    out_f32 = ce_predictor_forward(params, masked_embeddings, word_embeddings, model_outputs,
                                   mask_ce, attention_mask, num_heads=HEADS,
                                   matmul_weight_dtype=jnp.float32)
    out_f32 = jax.block_until_ready(out_f32)
    np.testing.assert_allclose(np.asarray(out_f32), np.asarray(ref), rtol=2e-3, atol=2e-3)

    # Default production path (bf16 weights, f32 accumulation): looser parity check.
    out_bf16 = ce_predictor_forward(params, masked_embeddings, word_embeddings, model_outputs,
                                    mask_ce, attention_mask, num_heads=HEADS)
    out_bf16 = jax.block_until_ready(out_bf16)
    np.testing.assert_allclose(np.asarray(out_bf16), np.asarray(ref), rtol=5e-2, atol=1e-2)

    print("KERNEL_OK")
</pallas_src>

<mosaic_0001>
module attributes {stable_mosaic.version = 11 : i64} {
  func.func @ce_predictor_kernel(%arg0: i32, %arg1: i32, %arg2: memref<2x8x32xf32, #tpu.memory_space<vmem>>, %arg3: memref<2x1x8xf32, #tpu.memory_space<vmem>>, %arg4: memref<1x32x32xf32, #tpu.memory_space<vmem>>, %arg5: memref<1x1x32xf32, #tpu.memory_space<vmem>>, %arg6: memref<1x32x32xf32, #tpu.memory_space<vmem>>, %arg7: memref<1x1x32xf32, #tpu.memory_space<vmem>>, %arg8: memref<1x32x32xf32, #tpu.memory_space<vmem>>, %arg9: memref<1x1x32xf32, #tpu.memory_space<vmem>>, %arg10: memref<1x32x32xf32, #tpu.memory_space<vmem>>, %arg11: memref<1x1x32xf32, #tpu.memory_space<vmem>>, %arg12: memref<1x1x32xf32, #tpu.memory_space<vmem>>, %arg13: memref<1x1x32xf32, #tpu.memory_space<vmem>>, %arg14: memref<1x32x64xf32, #tpu.memory_space<vmem>>, %arg15: memref<1x1x64xf32, #tpu.memory_space<vmem>>, %arg16: memref<1x64x32xf32, #tpu.memory_space<vmem>>, %arg17: memref<1x1x32xf32, #tpu.memory_space<vmem>>, %arg18: memref<1x1x32xf32, #tpu.memory_space<vmem>>, %arg19: memref<1x1x32xf32, #tpu.memory_space<vmem>>, %arg20: memref<2x8x32xf32, #tpu.memory_space<vmem>>, %arg21: memref<16x32xf32, #tpu.memory_space<vmem>>, %arg22: memref<2x8x32xf32, #tpu.memory_space<vmem>>) attributes {dimension_semantics = [#tpu.dimension_semantics<parallel>, #tpu.dimension_semantics<arbitrary>], iteration_bounds = array<i64: 2, 2>, scalar_prefetch = 0 : i64, scratch_operands = 2 : i64, tpu.core_type = #tpu.core_type<tc>, window_params = [{transform_indices = @transform_0, window_bounds = array<i64: 2, 8, 32>}, {transform_indices = @transform_1, window_bounds = array<i64: 2, 1, 8>}, {transform_indices = @transform_2, window_bounds = array<i64: 1, 32, 32>}, {transform_indices = @transform_3, window_bounds = array<i64: 1, 1, 32>}, {transform_indices = @transform_4, window_bounds = array<i64: 1, 32, 32>}, {transform_indices = @transform_5, window_bounds = array<i64: 1, 1, 32>}, {transform_indices = @transform_6, window_bounds = array<i64: 1, 32, 32>}, {transform_indices = @transform_7, window_bounds = array<i64: 1, 1, 32>}, {transform_indices = @transform_8, window_bounds = array<i64: 1, 32, 32>}, {transform_indices = @transform_9, window_bounds = array<i64: 1, 1, 32>}, {transform_indices = @transform_10, window_bounds = array<i64: 1, 1, 32>}, {transform_indices = @transform_11, window_bounds = array<i64: 1, 1, 32>}, {transform_indices = @transform_12, window_bounds = array<i64: 1, 32, 64>}, {transform_indices = @transform_13, window_bounds = array<i64: 1, 1, 64>}, {transform_indices = @transform_14, window_bounds = array<i64: 1, 64, 32>}, {transform_indices = @transform_15, window_bounds = array<i64: 1, 1, 32>}, {transform_indices = @transform_16, window_bounds = array<i64: 1, 1, 32>}, {transform_indices = @transform_17, window_bounds = array<i64: 1, 1, 32>}, {transform_indices = @transform_18, window_bounds = array<i64: 2, 8, 32>}]} {
    %c0_i32 = arith.constant 0 : i32
    %0 = arith.cmpi eq, %arg1, %c0_i32 : i32
    %1 = arith.extui %0 : i1 to i32
    %c0_i32_0 = arith.constant 0 : i32
    %2 = arith.cmpi ne, %1, %c0_i32_0 : i32
    scf.if %2 {
      %c0_93 = arith.constant 0 : index
      %c0_94 = arith.constant 0 : index
      %c0_95 = arith.constant 0 : index
      %167 = vector.load %arg2[%c0_93, %c0_94, %c0_95] : memref<2x8x32xf32, #tpu.memory_space<vmem>>, vector<2x8x32xf32>
      %168 = vector.shape_cast %167 : vector<2x8x32xf32> to vector<16x32xf32>
      %c0_96 = arith.constant 0 : index
      %c0_97 = arith.constant 0 : index
      %169 = vector.load %arg21[%c0_96, %c0_97] : memref<16x32xf32, #tpu.memory_space<vmem>>, vector<16x32xf32>
      tpu.vector_store %arg21[%c0_96, %c0_97], %168 {strides = array<i32>} : memref<16x32xf32, #tpu.memory_space<vmem>>, vector<16x32xf32>,
    } else {
    }
    %c0 = arith.constant 0 : index
    %c0_1 = arith.constant 0 : index
    %3 = vector.load %arg21[%c0, %c0_1] : memref<16x32xf32, #tpu.memory_space<vmem>>, vector<16x32xf32>
    %c0_2 = arith.constant 0 : index
    %c0_3 = arith.constant 0 : index
    %c0_4 = arith.constant 0 : index
    %4 = vector.load %arg3[%c0_2, %c0_3, %c0_4] : memref<2x1x8xf32, #tpu.memory_space<vmem>>, vector<2x1x8xf32>
    %cst = arith.constant 1.000000e+00 : f32
    %5 = vector.broadcast %cst : f32 to vector<2x1x8xf32>
    %6 = arith.subf %5, %4 : vector<2x1x8xf32>
    %cst_5 = arith.constant -1.000000e+04 : f32
    %7 = vector.broadcast %cst_5 : f32 to vector<2x1x8xf32>
    %8 = arith.mulf %6, %7 : vector<2x1x8xf32>
    %9 = vector.shape_cast %8 : vector<2x1x8xf32> to vector<2x1x8xf32>
    %10 = vector.broadcast %9 : vector<2x1x8xf32> to vector<2x8x8xf32>
    %c0_6 = arith.constant 0 : index
    %c0_7 = arith.constant 0 : index
    %c0_8 = arith.constant 0 : index
    %11 = vector.load %arg4[%c0_6, %c0_7, %c0_8] : memref<1x32x32xf32, #tpu.memory_space<vmem>>, vector<1x32x32xf32>
    %12 = vector.shape_cast %11 : vector<1x32x32xf32> to vector<32x32xf32>
    %cst_9 = arith.constant dense<0.000000e+00> : vector<16x32xf32>
    %13 = tpu.matmul %3, %12, %cst_9 {dimension_numbers = #tpu.dot_dimension_numbers<[1], [0], [0], [1], [0, 0, 1, 1], [], []>} : vector<16x32xf32>, vector<32x32xf32>, vector<16x32xf32> -> vector<16x32xf32>
    %c0_10 = arith.constant 0 : index
    %c0_11 = arith.constant 0 : index
    %c0_12 = arith.constant 0 : index
    %14 = vector.load %arg5[%c0_10, %c0_11, %c0_12] : memref<1x1x32xf32, #tpu.memory_space<vmem>>, vector<1x1x32xf32>
    %15 = vector.shape_cast %14 : vector<1x1x32xf32> to vector<1x32xf32>
    %16 = vector.broadcast %15 : vector<1x32xf32> to vector<16x32xf32>
    %17 = arith.addf %13, %16 : vector<16x32xf32>
    %c0_13 = arith.constant 0 : index
    %c0_14 = arith.constant 0 : index
    %c0_15 = arith.constant 0 : index
    %18 = vector.load %arg6[%c0_13, %c0_14, %c0_15] : memref<1x32x32xf32, #tpu.memory_space<vmem>>, vector<1x32x32xf32>
    %19 = vector.shape_cast %18 : vector<1x32x32xf32> to vector<32x32xf32>
    %cst_16 = arith.constant dense<0.000000e+00> : vector<16x32xf32>
    %20 = tpu.matmul %3, %19, %cst_16 {dimension_numbers = #tpu.dot_dimension_numbers<[1], [0], [0], [1], [0, 0, 1, 1], [], []>} : vector<16x32xf32>, vector<32x32xf32>, vector<16x32xf32> -> vector<16x32xf32>
    %c0_17 = arith.constant 0 : index
    %c0_18 = arith.constant 0 : index
    %c0_19 = arith.constant 0 : index
    %21 = vector.load %arg7[%c0_17, %c0_18, %c0_19] : memref<1x1x32xf32, #tpu.memory_space<vmem>>, vector<1x1x32xf32>
    %22 = vector.shape_cast %21 : vector<1x1x32xf32> to vector<1x32xf32>
    %23 = vector.broadcast %22 : vector<1x32xf32> to vector<16x32xf32>
    %24 = arith.addf %20, %23 : vector<16x32xf32>
    %c0_20 = arith.constant 0 : index
    %c0_21 = arith.constant 0 : index
    %c0_22 = arith.constant 0 : index
    %25 = vector.load %arg8[%c0_20, %c0_21, %c0_22] : memref<1x32x32xf32, #tpu.memory_space<vmem>>, vector<1x32x32xf32>
    %26 = vector.shape_cast %25 : vector<1x32x32xf32> to vector<32x32xf32>
    %cst_23 = arith.constant dense<0.000000e+00> : vector<16x32xf32>
    %27 = tpu.matmul %3, %26, %cst_23 {dimension_numbers = #tpu.dot_dimension_numbers<[1], [0], [0], [1], [0, 0, 1, 1], [], []>} : vector<16x32xf32>, vector<32x32xf32>, vector<16x32xf32> -> vector<16x32xf32>
    %c0_24 = arith.constant 0 : index
    %c0_25 = arith.constant 0 : index
    %c0_26 = arith.constant 0 : index
    %28 = vector.load %arg9[%c0_24, %c0_25, %c0_26] : memref<1x1x32xf32, #tpu.memory_space<vmem>>, vector<1x1x32xf32>
    %29 = vector.shape_cast %28 : vector<1x1x32xf32> to vector<1x32xf32>
    %30 = vector.broadcast %29 : vector<1x32xf32> to vector<16x32xf32>
    %31 = arith.addf %27, %30 : vector<16x32xf32>
    %32 = vector.shape_cast %17 : vector<16x32xf32> to vector<2x8x32xf32>
    %33 = vector.shape_cast %24 : vector<16x32xf32> to vector<2x8x32xf32>
    %34 = vector.shape_cast %31 : vector<16x32xf32> to vector<2x8x32xf32>
    %35 = vector.extract_strided_slice %32 {offsets = [0, 0, 0], sizes = [2, 8, 16], strides = [1, 1, 1]} : vector<2x8x32xf32> to vector<2x8x16xf32>
    %36 = vector.extract_strided_slice %33 {offsets = [0, 0, 0], sizes = [2, 8, 16], strides = [1, 1, 1]} : vector<2x8x32xf32> to vector<2x8x16xf32>
    %37 = vector.extract_strided_slice %34 {offsets = [0, 0, 0], sizes = [2, 8, 16], strides = [1, 1, 1]} : vector<2x8x32xf32> to vector<2x8x16xf32>
    "tpu.trace_start"() <{level = 10 : i32, message = "bqd,bkd->bqk"}> : () -> ()
    %cst_27 = arith.constant dense<0.000000e+00> : vector<2x8x8xf32>
    %38 = tpu.matmul %35, %36, %cst_27 {dimension_numbers = #tpu.dot_dimension_numbers<[2], [2], [1], [1], [0, 0, 0, 1, 1, 1], [0], [0]>} : vector<2x8x16xf32>, vector<2x8x16xf32>, vector<2x8x8xf32> -> vector<2x8x8xf32>
    "tpu.trace_stop"() : () -> ()
    %cst_28 = arith.constant 2.500000e-01 : f32
    %39 = vector.broadcast %cst_28 : f32 to vector<2x8x8xf32>
    %40 = arith.mulf %38, %39 : vector<2x8x8xf32>
    %41 = arith.addf %40, %10 : vector<2x8x8xf32>
    %cst_29 = arith.constant dense<0xFF800000> : vector<2x8xf32>
    %42 = vector.multi_reduction <maximumf>, %41, %cst_29 [2] : vector<2x8x8xf32> to vector<2x8xf32>
    %43 = vector.shape_cast %42 : vector<2x8xf32> to vector<2x8x1xf32>
    %44 = vector.broadcast %43 : vector<2x8x1xf32> to vector<2x8x8xf32>
    %45 = arith.subf %41, %44 : vector<2x8x8xf32>
    %46 = math.exp %45 : vector<2x8x8xf32>
    %cst_30 = arith.constant dense<0.000000e+00> : vector<2x8xf32>
    %47 = vector.multi_reduction <add>, %46, %cst_30 [2] : vector<2x8x8xf32> to vector<2x8xf32>
    %48 = vector.shape_cast %47 : vector<2x8xf32> to vector<2x8x1xf32>
    %49 = tpu.reciprocal %48 {approx = true} : vector<2x8x1xf32> -> vector<2x8x1xf32>
    %50 = vector.broadcast %49 : vector<2x8x1xf32> to vector<2x8x8xf32>
    %51 = arith.mulf %46, %50 : vector<2x8x8xf32>
    "tpu.trace_start"() <{level = 10 : i32, message = "bqk,bkd->bqd"}> : () -> ()
    %cst_31 = arith.constant dense<0.000000e+00> : vector<2x8x16xf32>
    %52 = tpu.matmul %51, %37, %cst_31 {dimension_numbers = #tpu.dot_dimension_numbers<[2], [1], [1], [2], [0, 0, 0, 1, 1, 2], [0], [0]>} : vector<2x8x8xf32>, vector<2x8x16xf32>, vector<2x8x16xf32> -> vector<2x8x16xf32>
    "tpu.trace_stop"() : () -> ()
    %53 = vector.extract_strided_slice %32 {offsets = [0, 0, 16], sizes = [2, 8, 16], strides = [1, 1, 1]} : vector<2x8x32xf32> to vector<2x8x16xf32>
    %54 = vector.extract_strided_slice %33 {offsets = [0, 0, 16], sizes = [2, 8, 16], strides = [1, 1, 1]} : vector<2x8x32xf32> to vector<2x8x16xf32>
    %55 = vector.extract_strided_slice %34 {offsets = [0, 0, 16], sizes = [2, 8, 16], strides = [1, 1, 1]} : vector<2x8x32xf32> to vector<2x8x16xf32>
    "tpu.trace_start"() <{level = 10 : i32, message = "bqd,bkd->bqk"}> : () -> ()
    %cst_32 = arith.constant dense<0.000000e+00> : vector<2x8x8xf32>
    %56 = tpu.matmul %53, %54, %cst_32 {dimension_numbers = #tpu.dot_dimension_numbers<[2], [2], [1], [1], [0, 0, 0, 1, 1, 1], [0], [0]>} : vector<2x8x16xf32>, vector<2x8x16xf32>, vector<2x8x8xf32> -> vector<2x8x8xf32>
    "tpu.trace_stop"() : () -> ()
    %cst_33 = arith.constant 2.500000e-01 : f32
    %57 = vector.broadcast %cst_33 : f32 to vector<2x8x8xf32>
    %58 = arith.mulf %56, %57 : vector<2x8x8xf32>
    %59 = arith.addf %58, %10 : vector<2x8x8xf32>
    %cst_34 = arith.constant dense<0xFF800000> : vector<2x8xf32>
    %60 = vector.multi_reduction <maximumf>, %59, %cst_34 [2] : vector<2x8x8xf32> to vector<2x8xf32>
    %61 = vector.shape_cast %60 : vector<2x8xf32> to vector<2x8x1xf32>
    %62 = vector.broadcast %61 : vector<2x8x1xf32> to vector<2x8x8xf32>
    %63 = arith.subf %59, %62 : vector<2x8x8xf32>
    %64 = math.exp %63 : vector<2x8x8xf32>
    %cst_35 = arith.constant dense<0.000000e+00> : vector<2x8xf32>
    %65 = vector.multi_reduction <add>, %64, %cst_35 [2] : vector<2x8x8xf32> to vector<2x8xf32>
    %66 = vector.shape_cast %65 : vector<2x8xf32> to vector<2x8x1xf32>
    %67 = tpu.reciprocal %66 {approx = true} : vector<2x8x1xf32> -> vector<2x8x1xf32>
    %68 = vector.broadcast %67 : vector<2x8x1xf32> to vector<2x8x8xf32>
    %69 = arith.mulf %64, %68 : vector<2x8x8xf32>
    "tpu.trace_start"() <{level = 10 : i32, message = "bqk,bkd->bqd"}> : () -> ()
    %cst_36 = arith.constant dense<0.000000e+00> : vector<2x8x16xf32>
    %70 = tpu.matmul %69, %55, %cst_36 {dimension_numbers = #tpu.dot_dimension_numbers<[2], [1], [1], [2], [0, 0, 0, 1, 1, 2], [0], [0]>} : vector<2x8x8xf32>, vector<2x8x16xf32>, vector<2x8x16xf32> -> vector<2x8x16xf32>
    "tpu.trace_stop"() : () -> ()
    %71 = tpu.concatenate %52, %70 in 2 : vector<2x8x16xf32>, vector<2x8x16xf32> -> vector<2x8x32xf32>
    %c0_37 = arith.constant 0 : index
    %c0_38 = arith.constant 0 : index
    %c0_39 = arith.constant 0 : index
    %72 = vector.load %arg22[%c0_37, %c0_38, %c0_39] : memref<2x8x32xf32, #tpu.memory_space<vmem>>, vector<2x8x32xf32>
    tpu.vector_store %arg22[%c0_37, %c0_38, %c0_39], %71 {strides = array<i32>} : memref<2x8x32xf32, #tpu.memory_space<vmem>>, vector<2x8x32xf32>,
    %c0_40 = arith.constant 0 : index
    %c0_41 = arith.constant 0 : index
    %c0_42 = arith.constant 0 : index
    %73 = vector.load %arg22[%c0_40, %c0_41, %c0_42] : memref<2x8x32xf32, #tpu.memory_space<vmem>>, vector<2x8x32xf32>
    %74 = vector.shape_cast %73 : vector<2x8x32xf32> to vector<16x32xf32>
    %c0_43 = arith.constant 0 : index
    %c0_44 = arith.constant 0 : index
    %c0_45 = arith.constant 0 : index
    %75 = vector.load %arg10[%c0_43, %c0_44, %c0_45] : memref<1x32x32xf32, #tpu.memory_space<vmem>>, vector<1x32x32xf32>
    %76 = vector.shape_cast %75 : vector<1x32x32xf32> to vector<32x32xf32>
    %cst_46 = arith.constant dense<0.000000e+00> : vector<16x32xf32>
    %77 = tpu.matmul %74, %76, %cst_46 {dimension_numbers = #tpu.dot_dimension_numbers<[1], [0], [0], [1], [0, 0, 1, 1], [], []>} : vector<16x32xf32>, vector<32x32xf32>, vector<16x32xf32> -> vector<16x32xf32>
    %c0_47 = arith.constant 0 : index
    %c0_48 = arith.constant 0 : index
    %c0_49 = arith.constant 0 : index
    %78 = vector.load %arg11[%c0_47, %c0_48, %c0_49] : memref<1x1x32xf32, #tpu.memory_space<vmem>>, vector<1x1x32xf32>
    %79 = vector.shape_cast %78 : vector<1x1x32xf32> to vector<1x32xf32>
    %80 = vector.broadcast %79 : vector<1x32xf32> to vector<16x32xf32>
    %81 = arith.addf %77, %80 : vector<16x32xf32>
    %82 = arith.addf %81, %3 : vector<16x32xf32>
    %c0_50 = arith.constant 0 : index
    %c0_51 = arith.constant 0 : index
    %c0_52 = arith.constant 0 : index
    %83 = vector.load %arg12[%c0_50, %c0_51, %c0_52] : memref<1x1x32xf32, #tpu.memory_space<vmem>>, vector<1x1x32xf32>
    %84 = vector.shape_cast %83 : vector<1x1x32xf32> to vector<1x32xf32>
    %c0_53 = arith.constant 0 : index
    %c0_54 = arith.constant 0 : index
    %c0_55 = arith.constant 0 : index
    %85 = vector.load %arg13[%c0_53, %c0_54, %c0_55] : memref<1x1x32xf32, #tpu.memory_space<vmem>>, vector<1x1x32xf32>
    %86 = vector.shape_cast %85 : vector<1x1x32xf32> to vector<1x32xf32>
    %cst_56 = arith.constant dense<0.000000e+00> : vector<16xf32>
    %87 = vector.multi_reduction <add>, %82, %cst_56 [1] : vector<16x32xf32> to vector<16xf32>
    %88 = vector.shape_cast %87 : vector<16xf32> to vector<16x1xf32>
    %cst_57 = arith.constant 3.200000e+01 : f32
    %89 = vector.broadcast %cst_57 : f32 to vector<16x1xf32>
    %90 = arith.divf %88, %89 : vector<16x1xf32>
    %91 = vector.broadcast %90 : vector<16x1xf32> to vector<16x32xf32>
    %92 = arith.subf %82, %91 : vector<16x32xf32>
    %93 = arith.mulf %92, %92 : vector<16x32xf32>
    %cst_58 = arith.constant dense<0.000000e+00> : vector<16xf32>
    %94 = vector.multi_reduction <add>, %93, %cst_58 [1] : vector<16x32xf32> to vector<16xf32>
    %95 = vector.shape_cast %94 : vector<16xf32> to vector<16x1xf32>
    %cst_59 = arith.constant 3.200000e+01 : f32
    %96 = vector.broadcast %cst_59 : f32 to vector<16x1xf32>
    %97 = arith.divf %95, %96 : vector<16x1xf32>
    %98 = vector.broadcast %90 : vector<16x1xf32> to vector<16x32xf32>
    %99 = arith.subf %82, %98 : vector<16x32xf32>
    %cst_60 = arith.constant 9.99999996E-13 : f32
    %100 = vector.broadcast %cst_60 : f32 to vector<16x1xf32>
    %101 = arith.addf %97, %100 : vector<16x1xf32>
    %102 = math.rsqrt %101 : vector<16x1xf32>
    %103 = vector.broadcast %102 : vector<16x1xf32> to vector<16x32xf32>
    %104 = arith.mulf %99, %103 : vector<16x32xf32>
    %105 = vector.broadcast %84 : vector<1x32xf32> to vector<16x32xf32>
    %106 = arith.mulf %104, %105 : vector<16x32xf32>
    %107 = vector.broadcast %86 : vector<1x32xf32> to vector<16x32xf32>
    %108 = arith.addf %106, %107 : vector<16x32xf32>
    %c0_61 = arith.constant 0 : index
    %c0_62 = arith.constant 0 : index
    %c0_63 = arith.constant 0 : index
    %109 = vector.load %arg14[%c0_61, %c0_62, %c0_63] : memref<1x32x64xf32, #tpu.memory_space<vmem>>, vector<1x32x64xf32>
    %110 = vector.shape_cast %109 : vector<1x32x64xf32> to vector<32x64xf32>
    %cst_64 = arith.constant dense<0.000000e+00> : vector<16x64xf32>
    %111 = tpu.matmul %108, %110, %cst_64 {dimension_numbers = #tpu.dot_dimension_numbers<[1], [0], [0], [1], [0, 0, 1, 1], [], []>} : vector<16x32xf32>, vector<32x64xf32>, vector<16x64xf32> -> vector<16x64xf32>
    %c0_65 = arith.constant 0 : index
    %c0_66 = arith.constant 0 : index
    %c0_67 = arith.constant 0 : index
    %112 = vector.load %arg15[%c0_65, %c0_66, %c0_67] : memref<1x1x64xf32, #tpu.memory_space<vmem>>, vector<1x1x64xf32>
    %113 = vector.shape_cast %112 : vector<1x1x64xf32> to vector<1x64xf32>
    %114 = vector.broadcast %113 : vector<1x64xf32> to vector<16x64xf32>
    %115 = arith.addf %111, %114 : vector<16x64xf32>
    %cst_68 = arith.constant 5.000000e-01 : f32
    %116 = vector.broadcast %cst_68 : f32 to vector<16x64xf32>
    %117 = arith.mulf %116, %115 : vector<16x64xf32>
    %cst_69 = arith.constant 4.471500e-02 : f32
    %118 = vector.broadcast %cst_69 : f32 to vector<16x64xf32>
    %119 = arith.mulf %118, %115 : vector<16x64xf32>
    %120 = arith.mulf %119, %115 : vector<16x64xf32>
    %121 = arith.mulf %120, %115 : vector<16x64xf32>
    %122 = arith.addf %115, %121 : vector<16x64xf32>
    %cst_70 = arith.constant 0.797884583 : f32
    %123 = vector.broadcast %cst_70 : f32 to vector<16x64xf32>
    %124 = arith.mulf %123, %122 : vector<16x64xf32>
    %125 = math.tanh %124 : vector<16x64xf32>
    %cst_71 = arith.constant 1.000000e+00 : f32
    %126 = vector.broadcast %cst_71 : f32 to vector<16x64xf32>
    %127 = arith.addf %126, %125 : vector<16x64xf32>
    %128 = arith.mulf %117, %127 : vector<16x64xf32>
    %c0_72 = arith.constant 0 : index
    %c0_73 = arith.constant 0 : index
    %c0_74 = arith.constant 0 : index
    %129 = vector.load %arg16[%c0_72, %c0_73, %c0_74] : memref<1x64x32xf32, #tpu.memory_space<vmem>>, vector<1x64x32xf32>
    %130 = vector.shape_cast %129 : vector<1x64x32xf32> to vector<64x32xf32>
    %cst_75 = arith.constant dense<0.000000e+00> : vector<16x32xf32>
    %131 = tpu.matmul %128, %130, %cst_75 {dimension_numbers = #tpu.dot_dimension_numbers<[1], [0], [0], [1], [0, 0, 1, 1], [], []>} : vector<16x64xf32>, vector<64x32xf32>, vector<16x32xf32> -> vector<16x32xf32>
    %c0_76 = arith.constant 0 : index
    %c0_77 = arith.constant 0 : index
    %c0_78 = arith.constant 0 : index
    %132 = vector.load %arg17[%c0_76, %c0_77, %c0_78] : memref<1x1x32xf32, #tpu.memory_space<vmem>>, vector<1x1x32xf32>
    %133 = vector.shape_cast %132 : vector<1x1x32xf32> to vector<1x32xf32>
    %134 = vector.broadcast %133 : vector<1x32xf32> to vector<16x32xf32>
    %135 = arith.addf %131, %134 : vector<16x32xf32>
    %136 = arith.addf %135, %108 : vector<16x32xf32>
    %c0_79 = arith.constant 0 : index
    %c0_80 = arith.constant 0 : index
    %c0_81 = arith.constant 0 : index
    %137 = vector.load %arg18[%c0_79, %c0_80, %c0_81] : memref<1x1x32xf32, #tpu.memory_space<vmem>>, vector<1x1x32xf32>
    %138 = vector.shape_cast %137 : vector<1x1x32xf32> to vector<1x32xf32>
    %c0_82 = arith.constant 0 : index
    %c0_83 = arith.constant 0 : index
    %c0_84 = arith.constant 0 : index
    %139 = vector.load %arg19[%c0_82, %c0_83, %c0_84] : memref<1x1x32xf32, #tpu.memory_space<vmem>>, vector<1x1x32xf32>
    %140 = vector.shape_cast %139 : vector<1x1x32xf32> to vector<1x32xf32>
    %cst_85 = arith.constant dense<0.000000e+00> : vector<16xf32>
    %141 = vector.multi_reduction <add>, %136, %cst_85 [1] : vector<16x32xf32> to vector<16xf32>
    %142 = vector.shape_cast %141 : vector<16xf32> to vector<16x1xf32>
    %cst_86 = arith.constant 3.200000e+01 : f32
    %143 = vector.broadcast %cst_86 : f32 to vector<16x1xf32>
    %144 = arith.divf %142, %143 : vector<16x1xf32>
    %145 = vector.broadcast %144 : vector<16x1xf32> to vector<16x32xf32>
    %146 = arith.subf %136, %145 : vector<16x32xf32>
    %147 = arith.mulf %146, %146 : vector<16x32xf32>
    %cst_87 = arith.constant dense<0.000000e+00> : vector<16xf32>
    %148 = vector.multi_reduction <add>, %147, %cst_87 [1] : vector<16x32xf32> to vector<16xf32>
    %149 = vector.shape_cast %148 : vector<16xf32> to vector<16x1xf32>
    %cst_88 = arith.constant 3.200000e+01 : f32
    %150 = vector.broadcast %cst_88 : f32 to vector<16x1xf32>
    %151 = arith.divf %149, %150 : vector<16x1xf32>
    %152 = vector.broadcast %144 : vector<16x1xf32> to vector<16x32xf32>
    %153 = arith.subf %136, %152 : vector<16x32xf32>
    %cst_89 = arith.constant 9.99999996E-13 : f32
    %154 = vector.broadcast %cst_89 : f32 to vector<16x1xf32>
    %155 = arith.addf %151, %154 : vector<16x1xf32>
    %156 = math.rsqrt %155 : vector<16x1xf32>
    %157 = vector.broadcast %156 : vector<16x1xf32> to vector<16x32xf32>
    %158 = arith.mulf %153, %157 : vector<16x32xf32>
    %159 = vector.broadcast %138 : vector<1x32xf32> to vector<16x32xf32>
    %160 = arith.mulf %158, %159 : vector<16x32xf32>
    %161 = vector.broadcast %140 : vector<1x32xf32> to vector<16x32xf32>
    %162 = arith.addf %160, %161 : vector<16x32xf32>
    %c0_90 = arith.constant 0 : index
    %c0_91 = arith.constant 0 : index
    %163 = vector.load %arg21[%c0_90, %c0_91] : memref<16x32xf32, #tpu.memory_space<vmem>>, vector<16x32xf32>
    tpu.vector_store %arg21[%c0_90, %c0_91], %162 {strides = array<i32>} : memref<16x32xf32, #tpu.memory_space<vmem>>, vector<16x32xf32>,
    %c1_i32 = arith.constant 1 : i32
    %164 = arith.cmpi eq, %arg1, %c1_i32 : i32
    %165 = arith.extui %164 : i1 to i32
    %c0_i32_92 = arith.constant 0 : i32
    %166 = arith.cmpi ne, %165, %c0_i32_92 : i32
    scf.if %166 {
      %167 = vector.shape_cast %162 : vector<16x32xf32> to vector<2x8x32xf32>
      %c0_93 = arith.constant 0 : index
      %c0_94 = arith.constant 0 : index
      %c0_95 = arith.constant 0 : index
      %168 = vector.load %arg20[%c0_93, %c0_94, %c0_95] : memref<2x8x32xf32, #tpu.memory_space<vmem>>, vector<2x8x32xf32>
      tpu.vector_store %arg20[%c0_93, %c0_94, %c0_95], %167 {strides = array<i32>} : memref<2x8x32xf32, #tpu.memory_space<vmem>>, vector<2x8x32xf32>,
    } else {
    }
    return
  }
  func.func @transform_0(%arg0: i32, %arg1: i32) -> (i32, i32, i32) {
    %c0_i32 = arith.constant 0 : i32
    %c0_i32_0 = arith.constant 0 : i32
    %c0_i32_1 = arith.constant 0 : i32
    return %arg0, %c0_i32, %c0_i32_0 : i32, i32, i32
  }
  func.func @transform_1(%arg0: i32, %arg1: i32) -> (i32, i32, i32) {
    %c0_i32 = arith.constant 0 : i32
    %c0_i32_0 = arith.constant 0 : i32
    %c0_i32_1 = arith.constant 0 : i32
    return %arg0, %c0_i32, %c0_i32_0 : i32, i32, i32
  }
  func.func @transform_2(%arg0: i32, %arg1: i32) -> (i32, i32, i32) {
    %c0_i32 = arith.constant 0 : i32
    %c0_i32_0 = arith.constant 0 : i32
    %c0_i32_1 = arith.constant 0 : i32
    return %arg1, %c0_i32, %c0_i32_0 : i32, i32, i32
  }
  func.func @transform_3(%arg0: i32, %arg1: i32) -> (i32, i32, i32) {
    %c0_i32 = arith.constant 0 : i32
    %c0_i32_0 = arith.constant 0 : i32
    %c0_i32_1 = arith.constant 0 : i32
    return %arg1, %c0_i32, %c0_i32_0 : i32, i32, i32
  }
  func.func @transform_4(%arg0: i32, %arg1: i32) -> (i32, i32, i32) {
    %c0_i32 = arith.constant 0 : i32
    %c0_i32_0 = arith.constant 0 : i32
    %c0_i32_1 = arith.constant 0 : i32
    return %arg1, %c0_i32, %c0_i32_0 : i32, i32, i32
  }
  func.func @transform_5(%arg0: i32, %arg1: i32) -> (i32, i32, i32) {
    %c0_i32 = arith.constant 0 : i32
    %c0_i32_0 = arith.constant 0 : i32
    %c0_i32_1 = arith.constant 0 : i32
    return %arg1, %c0_i32, %c0_i32_0 : i32, i32, i32
  }
  func.func @transform_6(%arg0: i32, %arg1: i32) -> (i32, i32, i32) {
    %c0_i32 = arith.constant 0 : i32
    %c0_i32_0 = arith.constant 0 : i32
    %c0_i32_1 = arith.constant 0 : i32
    return %arg1, %c0_i32, %c0_i32_0 : i32, i32, i32
  }
  func.func @transform_7(%arg0: i32, %arg1: i32) -> (i32, i32, i32) {
    %c0_i32 = arith.constant 0 : i32
    %c0_i32_0 = arith.constant 0 : i32
    %c0_i32_1 = arith.constant 0 : i32
    return %arg1, %c0_i32, %c0_i32_0 : i32, i32, i32
  }
  func.func @transform_8(%arg0: i32, %arg1: i32) -> (i32, i32, i32) {
    %c0_i32 = arith.constant 0 : i32
    %c0_i32_0 = arith.constant 0 : i32
    %c0_i32_1 = arith.constant 0 : i32
    return %arg1, %c0_i32, %c0_i32_0 : i32, i32, i32
  }
  func.func @transform_9(%arg0: i32, %arg1: i32) -> (i32, i32, i32) {
    %c0_i32 = arith.constant 0 : i32
    %c0_i32_0 = arith.constant 0 : i32
    %c0_i32_1 = arith.constant 0 : i32
    return %arg1, %c0_i32, %c0_i32_0 : i32, i32, i32
  }
  func.func @transform_10(%arg0: i32, %arg1: i32) -> (i32, i32, i32) {
    %c0_i32 = arith.constant 0 : i32
    %c0_i32_0 = arith.constant 0 : i32
    %c0_i32_1 = arith.constant 0 : i32
    return %arg1, %c0_i32, %c0_i32_0 : i32, i32, i32
  }
  func.func @transform_11(%arg0: i32, %arg1: i32) -> (i32, i32, i32) {
    %c0_i32 = arith.constant 0 : i32
    %c0_i32_0 = arith.constant 0 : i32
    %c0_i32_1 = arith.constant 0 : i32
    return %arg1, %c0_i32, %c0_i32_0 : i32, i32, i32
  }
  func.func @transform_12(%arg0: i32, %arg1: i32) -> (i32, i32, i32) {
    %c0_i32 = arith.constant 0 : i32
    %c0_i32_0 = arith.constant 0 : i32
    %c0_i32_1 = arith.constant 0 : i32
    return %arg1, %c0_i32, %c0_i32_0 : i32, i32, i32
  }
  func.func @transform_13(%arg0: i32, %arg1: i32) -> (i32, i32, i32) {
    %c0_i32 = arith.constant 0 : i32
    %c0_i32_0 = arith.constant 0 : i32
    %c0_i32_1 = arith.constant 0 : i32
    return %arg1, %c0_i32, %c0_i32_0 : i32, i32, i32
  }
  func.func @transform_14(%arg0: i32, %arg1: i32) -> (i32, i32, i32) {
    %c0_i32 = arith.constant 0 : i32
    %c0_i32_0 = arith.constant 0 : i32
    %c0_i32_1 = arith.constant 0 : i32
    return %arg1, %c0_i32, %c0_i32_0 : i32, i32, i32
  }
  func.func @transform_15(%arg0: i32, %arg1: i32) -> (i32, i32, i32) {
    %c0_i32 = arith.constant 0 : i32
    %c0_i32_0 = arith.constant 0 : i32
    %c0_i32_1 = arith.constant 0 : i32
    return %arg1, %c0_i32, %c0_i32_0 : i32, i32, i32
  }
  func.func @transform_16(%arg0: i32, %arg1: i32) -> (i32, i32, i32) {
    %c0_i32 = arith.constant 0 : i32
    %c0_i32_0 = arith.constant 0 : i32
    %c0_i32_1 = arith.constant 0 : i32
    return %arg1, %c0_i32, %c0_i32_0 : i32, i32, i32
  }
  func.func @transform_17(%arg0: i32, %arg1: i32) -> (i32, i32, i32) {
    %c0_i32 = arith.constant 0 : i32
    %c0_i32_0 = arith.constant 0 : i32
    %c0_i32_1 = arith.constant 0 : i32
    return %arg1, %c0_i32, %c0_i32_0 : i32, i32, i32
  }
  func.func @transform_18(%arg0: i32, %arg1: i32) -> (i32, i32, i32) {
    %c0_i32 = arith.constant 0 : i32
    %c0_i32_0 = arith.constant 0 : i32
    %c0_i32_1 = arith.constant 0 : i32
    return %arg0, %c0_i32, %c0_i32_0 : i32, i32, i32
  }
}

</mosaic_0001>

<bundles_post_ra>
// kernel: tpu_custom_call.1
= control target key start
LH: loop header
LB: loop body
LE: loop exit
PB: predicated region body
PF: predicated region fallthrough
CT: control target
= control target key end

     0   :  { %s4107_s0 = inlined_call_operand.hbm [shape: f32[4,8,32], index: 0, kind: input, shape index: {}]   ;;  %s4108_s1 = inlined_call_operand.hbm [shape: f32[4,1,8], index: 1, kind: input, shape index: {}]   ;;  %s4109_s2 = inlined_call_operand.vmem [shape: f32[2,32,32], index: 2, kind: input, shape index: {}]   ;;  %s4110_s3 = inlined_call_operand.vmem [shape: f32[2,1,32], index: 3, kind: input, shape index: {}]   ;;  %s4111_s4 = inlined_call_operand.vmem [shape: f32[2,32,32], index: 4, kind: input, shape index: {}]   ;;  %s4112_s5 = inlined_call_operand.vmem [shape: f32[2,1,32], index: 5, kind: input, shape index: {}]   ;;  %s4113_s6 = inlined_call_operand.vmem [shape: f32[2,32,32], index: 6, kind: input, shape index: {}]   ;;  %s4114_s7 = inlined_call_operand.vmem [shape: f32[2,1,32], index: 7, kind: input, shape index: {}]   ;;  %s4115_s8 = inlined_call_operand.hbm [shape: f32[2,32,32], index: 8, kind: input, shape index: {}]   ;;  %s4116_s9 = inlined_call_operand.vmem [shape: f32[2,1,32], index: 9, kind: input, shape index: {}]   ;;  %s4117_s10 = inlined_call_operand.vmem [shape: f32[2,1,32], index: 10, kind: input, shape index: {}]   ;;  %s4118_s11 = inlined_call_operand.vmem [shape: f32[2,1,32], index: 11, kind: input, shape index: {}]   ;;  %s4119_s12 = inlined_call_operand.hbm [shape: f32[2,32,64], index: 12, kind: input, shape index: {}]   ;;  %s4120_s13 = inlined_call_operand.vmem [shape: f32[2,1,64], index: 13, kind: input, shape index: {}]   ;;  %s4121_s14 = inlined_call_operand.vmem [shape: f32[2,64,32], index: 14, kind: input, shape index: {}]   ;;  %s4122_s15 = inlined_call_operand.vmem [shape: f32[2,1,32], index: 15, kind: input, shape index: {}]   ;;  %s4123_s16 = inlined_call_operand.vmem [shape: f32[2,1,32], index: 16, kind: input, shape index: {}]   ;;  %s4124_s17 = inlined_call_operand.vmem [shape: f32[2,1,32], index: 17, kind: input, shape index: {}]   ;;  %s4125_s18 = inlined_call_operand.hbm [shape: f32[4,8,32], index: 18, kind: output, shape index: {}]  }
   0x1   :  { %4159 = sst [smem:[#allocation35_spill]] %s4107_s0 }
   0x2   :  { %4160 = sst [smem:[#allocation36_spill]] %s4108_s1 }
   0x3   :  { %4161 = sst [smem:[#allocation37_spill]] %s4109_s2 }
   0x4   :  { %4162 = sst [smem:[#allocation38_spill]] %s4111_s4 }
   0x5   :  { %4163 = sst [smem:[#allocation39_spill]] %s4112_s5 }
   0x6   :  { %4164 = sst [smem:[#allocation40_spill]] %s4113_s6 }
   0x7   :  { %4165 = sst [smem:[#allocation41_spill]] %s4114_s7 }
   0x8   :  { %4166 = sst [smem:[#allocation42_spill]] %s4115_s8 }
   0x9   :  { %4167 = sst [smem:[#allocation43_spill]] %s4116_s9 }
   0xa   :  { %4168 = sst [smem:[#allocation44_spill]] %s4117_s10 }
   0xb   :  { %4169 = sst [smem:[#allocation45_spill]] %s4118_s11 }
   0xc   :  { %4170 = sst [smem:[#allocation46_spill]] %s4119_s12 }
   0xd   :  { %4171 = sst [smem:[#allocation47_spill]] %s4120_s13 }
   0xe   :  { %4172 = sst [smem:[#allocation48_spill]] %s4121_s14 }
   0xf   :  { %4173 = sst [smem:[#allocation49_spill]] %s4122_s15 }
  0x10   :  { %4174 = sst [smem:[#allocation50_spill]] %s4123_s16 }
  0x11   :  { %4175 = sst [smem:[#allocation51_spill]] %s4124_s17 }
  0x12   :  { %4176 = sst [smem:[#allocation52_spill]] %s4125_s18 }
  0x13   :  { %23 = vsyncpa [#allocation5], 0 }
  0x14   :  { %25 = vsyncpa [#allocation5 + $0x1], 0 }
  0x15   :  { %26 = vsyncpa [#allocation8], 0 }
  0x16   :  { %28 = vsyncpa [#allocation8 + $0x1], 0 }
  0x17   :  { %29 = vsyncpa [#allocation11], 0 }
  0x18   :  { %31 = vsyncpa [#allocation11 + $0x1], 0 }
  0x19   :  { %32 = vsyncpa [#allocation6], 0 }
  0x1a   :  { %34 = vsyncpa [#allocation6 + $0x1], 0  ;;  %s3445_s27 = smov 0   ;;  %s3447_s28 = smov 0  }
  0x1b   :  { %s3449_s29 = smov 0   ;;  %s3451_s30 = smov 0  }
  0x1c   :  { %s3453_s0 = smov 0   ;;  %s3455_s19 = smov 0  }
  0x1d   :  { %s3457_s1 = smov 0   ;;  %s3459_s20 = smov 0  }
  0x1e   :  { %s3461_s21 = smov 0   ;;  %s3463_s22 = smov 0  }
  0x1f   :  { %s3465_s2 = smov 0  }
  0x20 LB: > { %4177 = sst [smem:[#allocation18_spill]] %s3297_s28  ;;  %s3501_s23 = sadd.s32 4294967295, %s3333_s2   ;;  %s3333_s2 = sphi %s3465_s2, %s40_s2   ;;  %s3329_s22 = sphi %s3463_s22, %s4264_s22   ;;  %s3325_s21 = sphi %s3461_s21, %s4263_s21   ;;  %s3321_s20 = sphi %s3459_s20, %s4262_s20   ;;  %s3317_s1 = sphi %s3457_s1, %s4261_s1   ;;  %s3313_s19 = sphi %s3455_s19, %s4260_s19   ;;  %s3309_s0 = sphi %s3453_s0, %s4259_s0   ;;  %s3305_s30 = sphi %s3451_s30, %s4258_s30   ;;  %s3301_s29 = sphi %s3449_s29, %s4257_s29   ;;  %s3297_s28 = sphi %s3447_s28, %s4256_s28   ;;  %s3293_s27 = sphi %s3445_s27, %s4255_s27  }
  0x21   : > { %4178 = sst [smem:[#allocation19_spill]] %s3301_s29  ;;  %s2619_s24 = sadd.s32 4294967294, %s3333_s2  }
  0x22   : > { %4179 = sst [smem:[#allocation20_spill]] %s3305_s30  ;;  %p66_p0 = scmp.ne.s32.totalorder %s3313_s19, %s3309_s0 }
  0x23   : > { %4180 = sst [smem:[#allocation21_spill]] %s3309_s0  ;;  %p4135_p1 = scmp.eq.s32.totalorder %s3333_s2, 0 }
  0x24   : > { %4181 = sst [smem:[#allocation22_spill]] %s3313_s19  ;;  %p72_p2 = scmp.ne.s32.totalorder %s3309_s0, %s3305_s30 }
  0x25   : > { %4182 = sst [smem:[#allocation23_spill]] %s3321_s20  ;;  %p4134_p3 = scmp.eq.s32.totalorder %s3501_s23, 0 }
  0x26   : > { %4183 = sst [smem:[#allocation24_spill]] %s3325_s21  ;;  %p68_p4 = por %p4135_p1, %p66_p0 }
  0x27   : > { %4184 = sst [smem:[#allocation25_spill]] %s3329_s22  ;;  %p538_p5 = scmp.eq.s32.totalorder %s3501_s23, 3 }
  0x28   : > { %4185 = sst [smem:[#allocation26_spill]] %s3333_s2  ;;  %p3517_p6 = por %p4134_p3, %p72_p2 }
  0x29   : > { %p544_p7 = scmp.eq.s32.totalorder %s2619_s24, 3  ;;  %p3521_p8 = por %p538_p5, %p66_p0 }
  0x2a   : > { %s4186_s18 = scalar_select %p3517_p6, 1, 0 }
  0x2b   : > { %s4187_s20 = scalar_select %p3521_p8, 1, 0 }
  0x2c   : > { %p3525_p9 = por %p544_p7, %p72_p2  ;;  %p4133_p10 = scmp.lt.s32.totalorder %s3333_s2, 4 }
  0x2d   : > { %4188 = sst [smem:[#allocation27_spill]] %s4187_s20  ;;  %s3531_s25 = sand.u32 1, %s3313_s19  }
  0x2e   : > { %s4189_s26 = scalar_select %p3525_p9, 1, 0 }
  0x2f   : > { %s585_s30 = sand.u32 1, %s3333_s2   ;;  %p3536_p11 = pnand %p4133_p10, %p68_p4 }
  0x30   : > { %4190 = sst [smem:[#allocation28_spill]] %s4189_s26  ;;  %s2625_s24 = sshll.u32 %s3531_s25, 1 }
  0x31   : > { %s2690_s16 = sshll.u32 %s3329_s22, 5  ;;  %s4192_s14 = sld [smem:[#allocation36_spill]] }
  0x32   : > { %s589_s26 = scalar_lea.vmem [#allocation7], %s2625_s24  ;;  %s3550_s10 = scalar_lea.sflag [#allocation8], %s585_s30 }
  0x33   : > { %s596_s11 = sshll.u32 %s589_s26, 4  ;;  %p3081_p0 = pneg %p3536_p11  ;;  %s3547_s11 = int_to_ptr.vmem [resolvable:$true] %s596_s11 }
  0x37   : > { %s3545_s13 = scalar_lea.hbm %s4192_s14, %s2690_s16  ;;  %s3084_s20 = scalar_lea.hbm %s4192_s14, 64 }
  0x38   : > { %s3079_s9 = scalar_lea.hbm %s3545_s13, 32  ;;  %p3085_p5 = scmp.lt.u32.totalorder %s3545_s13, %s4192_s14 }
  0x39   : > { %p3080_p13 = scmp.ne.s32.totalorder %s3545_s13, %s3079_s9  ;;  %p3086_p7 = scmp.lt.u32.totalorder %s3084_s20, %s3079_s9 }
  0x3a   : > { %p3088_p3 = scmp.lt.u32.totalorder %s3079_s9, %s3545_s13 }
  0x3b   : > { %p3082_p2 = pnand %p3081_p0, %p3080_p13  ;;  %p3087_p10 = por %p3086_p7, %p3085_p5 }
  0x3d   : > { %p3083_p4 = pneg %p3082_p2  ;;  %p3089_p1 = por %p3088_p3, %p3087_p10 }
  0x3f   : > { %p3090_p12 = pnand %p3089_p1, %p3083_p4 }
  0x41   : > { %3093 = shalt.err (!%p3090_p12)
}
  0x42   : > { %s3094_s30 = scalar_lea.vmem %s3547_s11, 32  ;;  %s3335_s26 = smov [#allocation7]  }
  0x43   : > { %p3095_p13 = scmp.ne.s32.totalorder %s3547_s11, %s3094_s30  ;;  %s3099_s15 = sshll.u32 %s3335_s26, 4  ;;  %s3100_s15 = int_to_ptr.vmem [resolvable:$false] %s3099_s15 }
  0x44   : > { %s3101_s7 = scalar_lea.vmem %s3100_s15, 64  ;;  %p3102_p8 = scmp.lt.s32.totalorder %s3547_s11, %s3100_s15 }
  0x45   : > { %p3097_p2 = pnand %p3095_p13, %p3081_p0  ;;  %p3103_p5 = scmp.lt.s32.totalorder %s3101_s7, %s3094_s30 }
  0x47   : > { %p3098_p9 = pneg %p3097_p2  ;;  %p3104_p7 = por %p3103_p5, %p3102_p8 }
  0x49   : > { %p3105_p3 = pnand %p3104_p7, %p3098_p9 }
  0x4b   : > { %3108 = shalt.err (!%p3105_p3)
}
  0x4c   : > { %s3336_s9 = smov 16   ;;  %s3337_s16 = smov 1  }
  0x4d   : > { %2940 = dma.hbm_to_vmem [thread:$0]  (!%p3536_p11), %s3545_s13, 32, %s3547_s11, %s3550_s10, %s3336_s9, %s3336_s9, %s3337_s16  }
  0x4e   : > { %p738_p1 = scmp.lt.s32.totalorder %s3333_s2, 5  ;;  %p4193_p10 = scmp.ge.s32.totalorder %s3333_s2, 1 }
  0x4f   : > { %s2622_s24 = sshll.u32 %s3531_s25, 4  ;;  %s2689_s30 = sshll.u32 %s3329_s22, 8 }
  0x50   : > { %p3581_p12 = pnand %p4193_p10, %p738_p1  ;;  %s4195_s7 = sld [smem:[#allocation35_spill]] }
  0x51   : > { %s568_s6 = scalar_lea.vmem [#allocation4], %s2622_s24  ;;  %s565_s11 = scalar_lea.sflag [#allocation5], %s3531_s25 }
  0x52   : > { %s575_s5 = sshll.u32 %s568_s6, 4  ;;  %s3592_s5 = int_to_ptr.vmem [resolvable:$true] %s575_s5 }
  0x56   : > { %s3590_s14 = scalar_lea.hbm %s4195_s7, %s2689_s30  ;;  %s3114_s30 = scalar_lea.hbm %s4195_s7, 512 }
  0x57   : > { %s3109_s13 = scalar_lea.hbm %s3590_s14, 256  ;;  %p3115_p13 = scmp.lt.u32.totalorder %s3590_s14, %s4195_s7 }
  0x58   : > { %p3110_p8 = scmp.ne.s32.totalorder %s3590_s14, %s3109_s13  ;;  %p3116_p2 = scmp.lt.u32.totalorder %s3114_s30, %s3109_s13 }
  0x59   : > { %p3118_p7 = scmp.lt.u32.totalorder %s3109_s13, %s3590_s14 }
  0x5a   : > { %p3112_p9 = pnand %p3110_p8, %p3081_p0  ;;  %p3117_p5 = por %p3116_p2, %p3115_p13 }
  0x5c   : > { %p3113_p4 = pneg %p3112_p9  ;;  %p3119_p3 = por %p3118_p7, %p3117_p5 }
  0x5e   : > { %p3120_p1 = pnand %p3119_p3, %p3113_p4 }
  0x60   : > { %3123 = shalt.err (!%p3120_p1)
}
  0x61   : > { %s3124_s6 = scalar_lea.vmem %s3592_s5, 256  ;;  %s3338_s24 = smov [#allocation4]  }
  0x62   : > { %p3125_p10 = scmp.ne.s32.totalorder %s3592_s5, %s3124_s6  ;;  %s3129_s9 = sshll.u32 %s3338_s24, 4  ;;  %s3130_s9 = int_to_ptr.vmem [resolvable:$false] %s3129_s9 }
  0x63   : > { %s3131_s16 = scalar_lea.vmem %s3130_s9, 512  ;;  %p3132_p6 = scmp.lt.s32.totalorder %s3592_s5, %s3130_s9 }
  0x64   : > { %p3127_p8 = pnand %p3125_p10, %p3081_p0  ;;  %p3133_p13 = scmp.lt.s32.totalorder %s3131_s16, %s3124_s6 }
  0x66   : > { %p3128_p9 = pneg %p3127_p8  ;;  %p3134_p2 = por %p3133_p13, %p3132_p6 }
  0x68   : > { %p3135_p5 = pnand %p3134_p2, %p3128_p9 }
  0x6a   : > { %3138 = shalt.err (!%p3135_p5)
}
  0x6b   : > { %s4139_s13 = smov 128   ;;  %s4141_s30 = smov 8  }
  0x6c   : > { %2937 = dma.hbm_to_vmem [thread:$0]  (!%p3536_p11), %s3590_s14, 256, %s3592_s5, %s565_s11, %s4139_s13, %s4139_s13, %s4141_s30  }
  0x6d   : > { %s49_s26 = sadd.s32 1, %s3325_s21  ;;  %s267_s15 = sadd.s32 1, %s3301_s29 }
  0x6e   : > { %p50_p6 = scmp.ge.s32.totalorder %s49_s26, 2  ;;  %p274_p0 = scmp.ne.s32.totalorder %s3301_s29, %s3297_s28 }
  0x6f   : > { %p280_p4 = scmp.ne.s32.totalorder %s3297_s28, %s3293_s27  ;;  %s4197_s6 = sadd.s32 1, %s3329_s22 }
  0x70   : > { %s4266_s26 = smov (%p50_p6, %s49_s26), 0  ;;  %s4268_s6 = smov (!%p50_p6, %s4197_s6), %s3329_s22 }
  0x71   : > { %4196 = sst [smem:[#allocation29_spill]] %s4266_s26  ;;  %s264_s17 = ssub.s32 %s3325_s21, %s4266_s26 }
  0x72   : > { %p4198_p7 = scmp.eq.s32.totalorder %s3333_s2, 0  ;;  %p54_p11 = scmp.ge.s32.totalorder %s4268_s6, 2 }
  0x73   : > { %p265_p1 = scmp.eq.s32.totalorder %s264_s17, 0  ;;  %p4200_p10 = scmp.eq.s32.totalorder %s3501_s23, 0 }
  0x74   : > { %p3638_p3 = por %p274_p0, %p4198_p7  ;;  %s4145_s14 = sand.u32 1, %s3301_s29  }
  0x75   : > { %p3644_p8 = por %p280_p4, %p4200_p10  ;;  %s4270_s6 = smov (%p54_p11, %s4268_s6), 0 }
  0x76   : > { %4202 = sst [smem:[#allocation30_spill]] %s4270_s6  ;;  %s56_s11 = ssub.s32 %s3329_s22, %s4270_s6 }
  0x77   : > { %s4201_s5 = scalar_select %p3644_p8, 1, 0 }
  0x78   : > { %s3652_s27 = scalar_select %p265_p1, %s3301_s29, %s267_s15  }
  0x79   : > { %s2628_s24 = sshll.u32 %s4145_s14, 5  ;;  %p57_p9 = scmp.eq.s32.totalorder %s56_s11, 0 }
  0x7a   : > { %4203 = sst [smem:[#allocation31_spill]] %s3652_s27  ;;  %s2691_s9 = sshll.u32 %s3325_s21, 9 }
  0x7b   : > { %s652_s16 = scalar_lea.vmem [#allocation9], %s2628_s24  ;;  %s4204_s30 = sadd.s32 1, %s3313_s19 }
  0x7c   : > { %s659_s13 = sshll.u32 %s652_s16, 4  ;;  %s4206_s8 = sld [smem:[#allocation42_spill]]  ;;  %s3669_s13 = int_to_ptr.vmem [resolvable:$true] %s659_s13 }
  0x7d   : > { %s3662_s17 = scalar_select %p57_p9, %s3313_s19, %s4204_s30  }
  0x7e   : > { %p4207_p13 = scmp.lt.s32.totalorder %s3333_s2, 4  ;;  %s4209_s12 = sld [smem:[#allocation46_spill]] }
  0x7f   : > { %4205 = sst [smem:[#allocation32_spill]] %s3662_s17  ;;  %s691_s26 = scalar_lea.vmem [#allocation10], %s2628_s24 }
  0x80   : > { %p3675_p2 = pnand %p4207_p13, %p3638_p3  ;;  %s3684_s16 = sshll.u32 %s691_s26, 4  ;;  %s3716_s16 = int_to_ptr.vmem [resolvable:$true] %s3684_s16 }
  0x82   : > { %s3667_s4 = scalar_lea.hbm %s4206_s8, %s2691_s9  ;;  %p3141_p6 = pneg %p3675_p2 }
  0x83   : > { %s3139_s14 = scalar_lea.hbm %s3667_s4, 512  ;;  %s3144_s22 = scalar_lea.hbm %s4206_s8, 1024 }
  0x84   : > { %s3682_s7 = scalar_lea.hbm %s4209_s12, %s2691_s9  ;;  %p3140_p5 = scmp.ne.s32.totalorder %s3667_s4, %s3139_s14 }
  0x85   : > { %p3145_p7 = scmp.lt.u32.totalorder %s3667_s4, %s4206_s8  ;;  %p3146_p3 = scmp.lt.u32.totalorder %s3144_s22, %s3139_s14 }
  0x86   : > { %p3142_p0 = pnand %p3141_p6, %p3140_p5  ;;  %p3148_p1 = scmp.lt.u32.totalorder %s3139_s14, %s3667_s4 }
  0x87   : > { %p3147_p11 = por %p3146_p3, %p3145_p7 }
  0x88   : > { %p3143_p4 = pneg %p3142_p0 }
  0x89   : > { %p3149_p10 = por %p3148_p1, %p3147_p11 }
  0x8b   : > { %p3150_p9 = pnand %p3149_p10, %p3143_p4 }
  0x8d   : > { %3153 = shalt.err (!%p3150_p9)
}
  0x8e   : > { %s3154_s24 = scalar_lea.vmem %s3669_s13, 512  ;;  %s3341_s6 = smov [#allocation9]  }
  0x8f   : > { %p3155_p13 = scmp.ne.s32.totalorder %s3669_s13, %s3154_s24  ;;  %s3159_s9 = sshll.u32 %s3341_s6, 4  ;;  %s3160_s9 = int_to_ptr.vmem [resolvable:$false] %s3159_s9 }
  0x90   : > { %s3161_s26 = scalar_lea.vmem %s3160_s9, 1024  ;;  %p3162_p8 = scmp.lt.s32.totalorder %s3669_s13, %s3160_s9 }
  0x91   : > { %p3157_p5 = pnand %p3155_p13, %p3141_p6  ;;  %p3163_p7 = scmp.lt.s32.totalorder %s3161_s26, %s3154_s24 }
  0x93   : > { %p3158_p0 = pneg %p3157_p5  ;;  %p3164_p3 = por %p3163_p7, %p3162_p8 }
  0x95   : > { %p3165_p11 = pnand %p3164_p3, %p3158_p0 }
  0x97   : > { %3168 = shalt.err (!%p3165_p11)
}
  0x98   : > { %s4210_s22 = smov 8   ;;  %s4211_s14 = smov 128  }
  0x99   : > { %2943 = dma.hbm_to_vmem [thread:$0]  (!%p3675_p2), %s3667_s4, 512, %s3669_s13, %s3550_s10, %s4211_s14, %s4211_s14, %s4210_s22  }
  0x9a   : > { %s4212_s25 = sand.u32 1, %s3301_s29   ;;  %s3169_s30 = scalar_lea.hbm %s3682_s7, 512 }
  0x9b   : > { %s3720_s11 = scalar_lea.sflag [#allocation11], %s4212_s25  ;;  %p3170_p8 = scmp.ne.s32.totalorder %s3682_s7, %s3169_s30 }
  0x9c   : > { %s3174_s9 = scalar_lea.hbm %s4209_s12, 1024  ;;  %p3175_p10 = scmp.lt.u32.totalorder %s3682_s7, %s4209_s12 }
  0x9d   : > { %p3172_p4 = pnand %p3170_p8, %p3141_p6  ;;  %p3176_p9 = scmp.lt.u32.totalorder %s3174_s9, %s3169_s30 }
  0x9e   : > { %p3178_p5 = scmp.lt.u32.totalorder %s3169_s30, %s3682_s7 }
  0x9f   : > { %p3173_p1 = pneg %p3172_p4  ;;  %p3177_p13 = por %p3176_p9, %p3175_p10 }
  0xa1   : > { %p3179_p0 = por %p3178_p5, %p3177_p13 }
  0xa3   : > { %p3180_p7 = pnand %p3179_p0, %p3173_p1 }
  0xa5   : > { %3183 = shalt.err (!%p3180_p7)
}
  0xa6   : > { %s3184_s4 = scalar_lea.vmem %s3716_s16, 512  ;;  %s3342_s10 = smov [#allocation10]  }
  0xa7   : > { %p3185_p3 = scmp.ne.s32.totalorder %s3716_s16, %s3184_s4  ;;  %s3189_s13 = sshll.u32 %s3342_s10, 4  ;;  %s3190_s13 = int_to_ptr.vmem [resolvable:$false] %s3189_s13 }
  0xa8   : > { %s3191_s8 = scalar_lea.vmem %s3190_s13, 1024  ;;  %p3192_p4 = scmp.lt.s32.totalorder %s3716_s16, %s3190_s13 }
  0xa9   : > { %p3187_p11 = pnand %p3185_p3, %p3141_p6  ;;  %p3193_p10 = scmp.lt.s32.totalorder %s3191_s8, %s3184_s4 }
  0xab   : > { %p3188_p8 = pneg %p3187_p11  ;;  %p3194_p9 = por %p3193_p10, %p3192_p4 }
  0xad   : > { %p3195_p13 = pnand %p3194_p9, %p3188_p8 }
  0xaf   : > { %3198 = shalt.err (!%p3195_p13)
}
  0xb0   : > { %2946 = dma.hbm_to_vmem [thread:$0]  (!%p3675_p2), %s3682_s7, 512, %s3716_s16, %s3720_s11, %s4211_s14, %s4211_s14, %s4210_s22  }
  0xb1   : > { %742 = sbr.rel (%p3581_p12) target bundleno = 3192 (0xc78), region = 92 }
  0xb8   : > { %s3752_s25 = sand.u32 1, %s3309_s0   ;;  %p4213_p6 = scmp.ne.s32.totalorder %s4186_s18, 0 }
  0xb9   : > { %s4149_s30 = sshll.u32 %s3752_s25, 4  ;;  %s745_s24 = scalar_lea.sflag [#allocation5], %s3752_s25 }
  0xba   : > { %s3758_s15 = scalar_lea.vmem [#allocation4], %s4149_s30 }
  0xbb   : > { %3272 = dma.done.wait (%p4213_p6), %s745_s24, 256  }
  0xbc   : > { %3274 = vsyncadd (%p4213_p6), %s745_s24, 4294967040  ;;  %s753_s20 = sand.u32 1, %s3501_s23   ;;  %s2636_s7 = sshll.u32 %s3752_s25, 1 }
  0xbd   : > { %s754_s16 = scalar_lea.sflag [#allocation8], %s753_s20  ;;  %s3766_s22 = scalar_lea.vmem [#allocation7], %s2636_s7 }
  0xbe   : > { %3276 = dma.done.wait (%p4213_p6), %s754_s16, 32  }
  0xbf   : > { %3278 = vsyncadd (%p4213_p6), %s754_s16, 4294967264  ;;  %s764_s14 = sand.u32 1, %s3297_s28   ;;  %p4215_p12 = scmp.ne.s32.totalorder %s4201_s5, 0 }
  0xc0   : > { %s2637_s11 = sshll.u32 %s764_s14, 5 }
  0xc1   : > { %s3773_s6 = scalar_lea.vmem [#allocation9], %s2637_s11 }
  0xc2   : > { %4214 = sst [smem:[#allocation33_spill]] %s3773_s6 }
  0xc3   : > { %3280 = dma.done.wait (%p4215_p12), %s754_s16, 512  }
  0xc4   : > { %3282 = vsyncadd (%p4215_p12), %s754_s16, 4294966784  ;;  %s772_s23 = scalar_lea.sflag [#allocation11], %s764_s14  ;;  %s3779_s9 = scalar_lea.vmem [#allocation10], %s2637_s11 }
  0xc5   : > { %4216 = sst [smem:[#allocation34_spill]] %s3779_s9 }
  0xc6   : > { %3284 = dma.done.wait (%p4215_p12), %s772_s23, 512  }
  0xc7   : > { %3286 = vsyncadd (%p4215_p12), %s772_s23, 4294966784  ;;  %p895_p2 = scmp.lt.s32.totalorder %s3317_s1, 1  ;;  %s4217_s24 = sld [smem:[#allocation37_spill]] }
  0xc8   : > { %s4218_s14 = sld [smem:[#allocation38_spill]]  ;;  %s4220_s0 = sld [smem:[#allocation40_spill]] }
  0xc9   : > { %s3787_s18 = scalar_select %p895_p2, %s3317_s1, 1 }
  0xca   : > { %s4221_s10 = sld [smem:[#allocation41_spill]]  ;;  %s4229_s12 = sld [smem:[#allocation51_spill]] }
  0xcb   : > { %s2693_s26 = sshll.u32 %s3787_s18, 5  ;;  %s4230_s21 = sshll.u32 %s3752_s25, 4 }
  0xcc   : > { %s3851_s19 = scalar_lea.vmem [#allocation12], %s4230_s21  ;;  %p2648_p1 = scmp.ne.s32.totalorder %s3317_s1, 0 }
  0xcd   : > { %s899_s20 = scalar_lea.vmem %s4217_s24, %s2693_s26  ;;  %s4227_s24 = sld [smem:[#allocation49_spill]]  ;;  %v950_v0 = vld [vmem:[%s3758_s15] sm:$0xff] (!%p2648_p1)  ;;  %vm952_vm0 = vcmask (!%p2648_p1), 261120   ;;  %v951_v1 = vld [vmem:[%s3758_s15 + $0x8] sm:$0xff] (!%p2648_p1) }
  0xce   : > { %s3800_s11 = scalar_lea.vmem %s4218_s14, %s2693_s26  ;;  %s3809_s27 = scalar_lea.vmem %s4220_s0, %s2693_s26  ;;  %953 = vst.msk [vmem:[#allocation2] sm:$0xff] (!%p2648_p1), %vm952_vm0, %v950_v0  ;;  %954 = vst.msk [vmem:[#allocation2 + $0x8] sm:$0xff] (!%p2648_p1), %vm952_vm0, %v951_v1 }
  0xcf   : > { %s4225_s0 = sld [smem:[#allocation47_spill]]  ;;  %s2696_s26 = sshll.u32 %s3787_s18, 6 }
  0xd0   : > { %s918_s29 = scalar_lea.vmem %s4221_s10, %s3787_s18  ;;  %s4226_s10 = sld [smem:[#allocation48_spill]] }
  0xd1   : > { %s4228_s14 = sld [smem:[#allocation50_spill]]  ;;  %s944_s23 = scalar_lea.vmem %s4229_s12, %s3787_s18 }
  0xd2   : > { %949 = sbr.rel (%p2648_p1) target bundleno = 217 (0xd9), region = 112 }
  0xd3   : > { %s938_s28 = scalar_lea.vmem %s4227_s24, %s3787_s18 }
  0xd5   : > { %s930_s17 = scalar_lea.vmem %s4225_s0, %s3787_s18 }
  0xd6   : > { %s3835_s4 = scalar_lea.vmem %s4226_s10, %s2696_s26 }
  0xd7   : > { %s941_s2 = scalar_lea.vmem %s4228_s14, %s3787_s18 }
  0xd9 PF: > { %v975_v2 = vld [vmem:[%s899_s20] sm:$0xff]  ;;  %v976_v3 = vld [vmem:[%s899_s20 + $0x8] sm:$0xff]  ;;  %v977_v4 = vld [vmem:[%s899_s20 + $0x10] sm:$0xff]  ;;  %vm986_vm1 = vcmask 261120   ;;  %v3343_v16 = vmov 0.0   ;;  %vm3344_vm2 = vmmov 0   ;;  %s4233_s5 = scalar_lea.vmem %s4110_s3, %s3787_s18  ;;  %v965_v33 = vlaneseq }
  0xda   : > { %v2868_v5 = vpack.c.bf16 %v976_v3, %v975_v2  ;;  %v978_v6 = vld [vmem:[%s899_s20 + $0x18] sm:$0xff]  ;;  %v3856_v7 = vld [vmem:[#allocation2] sm:$0xff]  ;;  %v1069_v10 = vld [vmem:[%s3800_s11 + $0x8] sm:$0xff]  ;;  %s4231_s20 = sld [smem:[#allocation39_spill]]  ;;  %vm1240_vm3 = vcmask 130048   ;;  %s3345_s10 = smov 112  }
  0xdb   : > { %v2872_v8 = vpack.c.bf16 %v978_v6, %v977_v4  ;;  %2762 = vmatprep.mubr.msk.f32.mxu1 %vm986_vm1, %v3856_v7  ;;  %v1068_v9 = vld [vmem:[%s3800_s11] sm:$0xff]  ;;  %2784 = vmatprep.mubr.msk.f32.mxu0 %vm986_vm1, %v3856_v7  ;;  %v1070_v12 = vld [vmem:[%s3800_s11 + $0x10] sm:$0xff]  ;;  %v1071_v13 = vld [vmem:[%s3800_s11 + $0x18] sm:$0xff]  ;;  %v966_v36 = vshrl.u32 %v965_v33, 7  ;;  %vm1397_vm4 = vcmask 64512   ;;  %s3346_s8 = smov 16  }
  0xdc   : > { %2869 = vmatprep.subr.bf16.mxu1 %v2868_v5  ;;  %v2876_v11 = vpack.c.bf16 %v1069_v10, %v1068_v9  ;;  %v3866_v14 = vld [vmem:[#allocation2 + $0x8] sm:$0xff]  ;;  %v2880_v15 = vpack.c.bf16 %v1071_v13, %v1070_v12  ;;  %v2649_v23 = vld [vmem:[%s4233_s5] ss:$0 sm:$0xff]  ;;  %v1156_v29 = vld [vmem:[%s3809_s27 + $0x10] sm:$0xff]  ;;  %s4236_s16 = sld [smem:[#allocation43_spill]]  ;;  %s4238_s9 = sld [smem:[#allocation34_spill]] }
  0xdd   : > { %2871 = vmatpush3.bf16.msra.mxu1 %v2868_v5  ;;  %v1154_v27 = vld [vmem:[%s3809_s27] sm:$0xff]  ;;  %v1155_v28 = vld [vmem:[%s3809_s27 + $0x8] sm:$0xff]  ;;  %v1157_v31 = vld [vmem:[%s3809_s27 + $0x18] sm:$0xff]  ;;  %v967_v39 = vsub.s32 0, %v966_v36  ;;  %s4239_s21 = sld [smem:[#allocation44_spill]]  ;;  %vm2180_vm5 = vcmask 523264  }
  0xde   : > { %2873 = vmatprep.subr.bf16.mxu1 %v2872_v8  ;;  %v2884_v30 = vpack.c.bf16 %v1155_v28, %v1154_v27  ;;  %v2888_v32 = vpack.c.bf16 %v1157_v31, %v1156_v29  ;;  %v957_v34 = vld [vmem:[%s3766_s22] sm:$0x1]  ;;  %v958_v37 = vld [vmem:[%s3766_s22 + $0x1] sm:$0x1]  ;;  %p2683_p5 = scmp.ne.s32.totalorder %s3317_s1, 1 }
  0xdf   : > { %v959_v35 = vsub.f32 1.0, %v957_v34  ;;  %v960_v40 = vsub.f32 1.0, %v958_v37  ;;  %v2655_v1 = vld [vmem:[%s918_s29] ss:$0 sm:$0xff]  ;;  %s4235_s29 = sld [smem:[#allocation33_spill]] }
  0xe0   : > { %s4232_s11 = scalar_lea.vmem %s4231_s20, %s3787_s18  ;;  %2885 = vmatprep.subr.bf16.mxu0 %v2884_v30 }
  0xe1   : > { %2875 = vmatpush3.bf16.msra.mxu1 %v2872_v8  ;;  %v2652_v19 = vld [vmem:[%s4232_s11] ss:$0 sm:$0xff]  ;;  %2887 = vmatpush3.bf16.msra.mxu0 %v2884_v30  ;;  %v961_v38 = vmul.f32 -10000.0, %v959_v35  ;;  %v962_v42 = vmul.f32 -10000.0, %v960_v40  ;;  %s4241_s11 = sld [smem:[#allocation45_spill]] }
  0xe2   : > { %2877 = vmatprep.subr.bf16.mxu1 %v2876_v11  ;;  %2889 = vmatprep.subr.bf16.mxu0 %v2888_v32  ;;  %s4237_s14 = scalar_lea.vmem %s4236_s16, %s3787_s18 }
  0xe3   : > { %v3910_v41 = vrot.slane %v961_v38, %v967_v39  ;;  %v3913_v47 = vrot.slane %v962_v42, %v967_v39  ;;  %s4240_s15 = scalar_lea.vmem %s4239_s21, %s3787_s18 }
  0xe4   : > { %2763 = vmatmul.mubr.msk.f32.vlgmr.msra.gmra.mrb[0].mxu1 %vm986_vm1, %v3866_v14 }
  0xe5   : > { %2879 = vmatpush3.bf16.msra.mxu1 %v2876_v11  ;;  %2773 = vmatprep.mubr.msk.f32.mxu1 %vm986_vm1, %v3856_v7 }
  0xe6   : > { %2881 = vmatprep.subr.bf16.mxu1 %v2880_v15  ;;  %2891 = vmatpush3.bf16.msra.mxu0 %v2888_v32 }
  0xe7   : > { %2797 = vmatprep.subr.mxu0 %v3343_v16  ;;  %s4242_s0 = scalar_lea.vmem %s4241_s11, %s3787_s18 }
  0xe9   : > { %2883 = vmatpush3.bf16.msra.mxu1 %v2880_v15  ;;  %2785 = vmatmul.mubr.msk.f32.vlgmr.msra.gmra.mrb[0].mxu0 %vm986_vm1, %v3866_v14 }
  0xea   : > { %2787 = vmatprep.subr.mxu1 %v3343_v16  ;;  %2799 = vmatprep.mubr.msk.f32.mxu0 %vm3344_vm2, %v3343_v16 }
  0xec   : > { %2774 = vmatmul.mubr.msk.f32.vlgmr.msra.gmra.mrb[2].mxu1 %vm986_vm1, %v3866_v14 }
  0xed   : > { %2789 = vmatprep.mubr.msk.f32.mxu1 %vm3344_vm2, %v3343_v16 }
 0x1b7   : > { %v2764_v17 = vpop.f32.mrb[0].mxu1 }
 0x1b8   : > { %v1059_v18 = vpop.f32.mrb[1].mxu1  ;;  %v1065_v26 = vadd.f32 %v2764_v17, %v2649_v23 }
 0x1b9   : > { %v1060_v25 = vadd.f32 %v2649_v23, %v1059_v18 }
 0x1bc   : > { %v2786_v0 = vpop.f32.mrb[0].mxu0 }
 0x1bd   : > { %v1231_v2 = vpop.f32.mrb[1].mxu0  ;;  %v1237_v3 = vadd.f32 %v2786_v0, %v2655_v1 }
 0x1be   : > { %v1232_v4 = vadd.f32 %v2655_v1, %v1231_v2  ;;  %v2670_v1 = vld [vmem:[%s4237_s14] ss:$0 sm:$0xff] }
 0x1bf   : > { %v2775_v20 = vpop.f32.mrb[2].mxu1 }
 0x1c0   : > { %v1151_v21 = vadd.f32 %v2775_v20, %v2652_v19  ;;  %v1145_v22 = vpop.f32.mrb[3].mxu1  ;;  %2798 = vmatpush3.msra.mxu0 %v1232_v4 }
 0x1c1   : > { %v1146_v24 = vadd.f32 %v2652_v19, %v1145_v22  ;;  %2807 = vmatprep.subr.mxu0 %v3343_v16 }
 0x1c2   : > { %1646 = vrot.lane.b32.xlu1 %v1151_v21, %s3345_s10 }
 0x1c3   : > { %2788 = vmatpush3.xpose.msk.msra.mxu1 %vm1240_vm3, %v1146_v24 }
 0x1c4   : > { %2792 = vmatprep.subr.mxu1 %v3343_v16 }
 0x1c6   : > { %1566 = vrot.lane.b32.xlu1 %v1060_v25, %s3345_s10  ;;  %2790 = vmatmul.mubr.msk.f32.vlgmr.msra.gmra.mrb[4].mxu1 %vm1240_vm3, %v1060_v25 }
 0x1c7   : > { %2793 = vmatpush3.xpose.msk.msra.mxu1 %vm1240_vm3, %v1151_v21  ;;  %2794 = vmatprep.mubr.msk.f32.mxu1 %vm3344_vm2, %v3343_v16 }
 0x1c8   : > { %2802 = vmatprep.subr.mxu1 %v3343_v16 }
 0x1ca   : > { %2795 = vmatmul.mubr.msk.f32.vlgmr.msra.gmra.mrb[6].mxu1 %vm1240_vm3, %v1065_v26 }
 0x1cb   : > { %2804 = vmatprep.mubr.msk.f32.mxu1 %vm3344_vm2, %v3343_v16  ;;  %2803 = vmatpush3.msra.mxu1 %v1237_v3 }
 0x1cc   : > { %2812 = vmatprep.subr.mxu1 %v3343_v16 }
 0x234   : > { %v1647_v5 = vpop.permute.xlu1 %1646 }
 0x238   : > { %v1567_v6 = vpop.permute.xlu1 %1566 }
 0x299   : > { %v1313_v43 = vpop.f32.mrb[4].mxu1 }
 0x29a   : > { %v1393_v44 = vmul.f32 0.25, %v1313_v43  ;;  %v2791_v45 = vpop.f32.mrb[5].mxu1 }
 0x29c   : > { %v1395_v46 = vadd.f32 %v1393_v44, %v3910_v41 }
 0x29d   : > { %v1389_v48 = vpop.f32.mrb[6].mxu1 }
 0x29e   : > { %v1394_v49 = vmul.f32 0.25, %v1389_v48  ;;  %v2796_v50 = vpop.f32.mrb[7].mxu1  ;;  %v1398_v51 = vsel %vm1397_vm4, %v1395_v46, -inf }
 0x29f   : > { %1399 = vmax.xlane.f32.xlu0 %v1398_v51  ;;  %v1917_v50 = vld [vmem:[%s4235_s29 + $0x8] sm:$0xff] }
 0x2a0   : > { %v1396_v52 = vadd.f32 %v1394_v49, %v3913_v47  ;;  %v1916_v49 = vld [vmem:[%s4235_s29] sm:$0xff] }
 0x2a1   : > { %v2892_v51 = vpack.c.bf16 %v1917_v50, %v1916_v49  ;;  %v2170_v49 = vld [vmem:[%s3835_s4 + $0x28] sm:$0xff] }
 0x2a2   : > { %v1401_v53 = vsel %vm1397_vm4, %v1396_v52, -inf }
 0x2a3   : > { %1402 = vmax.xlane.f32.xlu0 %v1401_v53  ;;  %v1919_v53 = vld [vmem:[%s4235_s29 + $0x18] sm:$0xff] }
 0x2b9   : > { %1568 = vrot.lane.b32.xlu0 %v1146_v24, %s3345_s10 }
 0x32c   : > { %v1400_v54 = vpop.xlane.xlu0 %1399 }
 0x32d   : > { %v1404_v55 = vsub.f32 %v1395_v46, %v1400_v54 }
 0x32f   : > { %v1406_v56 = vmul.f32 1.442695, %v1404_v55 }
 0x330   : > { %v1403_v57 = vpop.xlane.xlu0 %1402 }
 0x331   : > { %3051 = vpow2.f32 %v1406_v56  ;;  %v1405_v58 = vsub.f32 %v1396_v52, %v1403_v57  ;;  %v1918_v52 = vld [vmem:[%s4235_s29 + $0x10] sm:$0xff] }
 0x332   : > { %v2896_v54 = vpack.c.bf16 %v1919_v53, %v1918_v52  ;;  %v2172_v52 = vld [vmem:[%s3835_s4 + $0x38] sm:$0xff] }
 0x333   : > { %v1408_v59 = vmul.f32 1.442695, %v1405_v58 }
 0x334   : > { %v1569_v12 = vpop.permute.xlu0 %1568 }
 0x335   : > { %3053 = vpow2.f32 %v1408_v59 }
 0x33b   : > { %v3052_v60 = vpop.eup %3051 }
 0x33c   : > { %v1410_v61 = vsel %vm1397_vm4, %v3052_v60, 0.0 }
 0x33d   : > { %1411 = vadd.xlane.f32.xlu1 %v1410_v61 }
 0x33f   : > { %v3054_v62 = vpop.eup %3053 }
 0x340   : > { %v1413_v63 = vsel %vm1397_vm4, %v3054_v62, 0.0 }
 0x341   : > { %1414 = vadd.xlane.f32.xlu1 %v1413_v63 }
 0x352   : > { %1644 = vrot.lane.b32.xlu1 %v1065_v26, %s3345_s10 }
 0x3ca   : > { %v1412_v8 = vpop.xlane.xlu1 %1411 }
 0x3cb   : > { %3055 = vrcp.f32 %v1412_v8 }
 0x3ce   : > { %v1415_v9 = vpop.xlane.xlu1 %1414 }
 0x3cf   : > { %3057 = vrcp.f32 %v1415_v9 }
 0x3d2   : > { %v1645_v17 = vpop.permute.xlu1 %1644 }
 0x3d5   : > { %v3056_v10 = vpop.eup %3055 }
 0x3d6   : > { %v1418_v11 = vmul.f32 %v3056_v10, %v3052_v60 }
 0x3d8   : > { %2800 = vmatmul.mubr.msk.f32.vlgmr.msra.gmra.mrb[2].mxu0 %vm1397_vm4, %v1418_v11 }
 0x3d9   : > { %v3058_v13 = vpop.eup %3057  ;;  %2808 = vmatpush3.xpose.msk.msra.mxu0 %vm1240_vm3, %v1569_v12  ;;  %2809 = vmatprep.mubr.msk.f32.mxu0 %vm3344_vm2, %v3343_v16 }
 0x3da   : > { %v1419_v15 = vmul.f32 %v3058_v13, %v3054_v62  ;;  %2817 = vmatprep.subr.mxu0 %v3343_v16 }
 0x3dc   : > { %2805 = vmatmul.mubr.msk.f32.vlgmr.msra.gmra.mrb[8].mxu1 %vm1397_vm4, %v1419_v15  ;;  %2810 = vmatmul.mubr.msk.f32.vlgmr.msra.gmra.mrb[4].mxu0 %vm1240_vm3, %v1567_v6 }
 0x3dd   : > { %2813 = vmatpush3.xpose.msk.msra.mxu1 %vm1240_vm3, %v1647_v5  ;;  %2814 = vmatprep.mubr.msk.f32.mxu1 %vm3344_vm2, %v3343_v16 }
 0x3de   : > { %2822 = vmatprep.subr.mxu1 %v3343_v16  ;;  %2819 = vmatprep.mubr.msk.f32.mxu0 %vm3344_vm2, %v3343_v16 }
 0x3e0   : > { %2815 = vmatmul.mubr.msk.f32.vlgmr.msra.gmra.mrb[10].mxu1 %vm1240_vm3, %v1645_v17 }
 0x3e1   : > { %2824 = vmatprep.mubr.msk.f32.mxu1 %vm3344_vm2, %v3343_v16 }
 0x4ab   : > { %v3945_v18 = vpop.f32.mrb[2].mxu0 }
 0x4ac   : > { %v2801_v19 = vpop.f32.mrb[3].mxu0 }
 0x4af   : > { %v3947_v20 = vpop.f32.mrb[8].mxu1  ;;  %v1640_v21 = vpop.f32.mrb[4].mxu0 }
 0x4b0   : > { %v1722_v22 = vmul.f32 0.25, %v1640_v21  ;;  %v2806_v23 = vpop.f32.mrb[9].mxu1  ;;  %v2811_v24 = vpop.f32.mrb[5].mxu0  ;;  %v2055_v21 = vld [vmem:[%s4238_s9] sm:$0xff] }
 0x4b1   : > { %v2057_v24 = vld [vmem:[%s4238_s9 + $0x10] sm:$0xff] }
 0x4b2   : > { %v1724_v25 = vadd.f32 %v1722_v22, %v3910_v41  ;;  %v2056_v22 = vld [vmem:[%s4238_s9 + $0x8] sm:$0xff] }
 0x4b3   : > { %v1718_v26 = vpop.f32.mrb[10].mxu1  ;;  %v2900_v23 = vpack.c.bf16 %v2056_v22, %v2055_v21 }
 0x4b4   : > { %v1723_v27 = vmul.f32 0.25, %v1718_v26  ;;  %v2816_v28 = vpop.f32.mrb[11].mxu1  ;;  %v1726_v29 = vsel %vm1397_vm4, %v1724_v25, -inf }
 0x4b5   : > { %1727 = vmax.xlane.f32.xlu0 %v1726_v29 }
 0x4b6   : > { %v1725_v30 = vadd.f32 %v1723_v27, %v3913_v47 }
 0x4b8   : > { %v1729_v16 = vsel %vm1397_vm4, %v1725_v30, -inf }
 0x4b9   : > { %1730 = vmax.xlane.f32.xlu1 %v1729_v16 }
 0x4ca   : > { %1826 = vrot.lane.b32.xlu1 %v1237_v3, %s3345_s10 }
 0x542   : > { %v1728_v31 = vpop.xlane.xlu0 %1727 }
 0x543   : > { %v1732_v32 = vsub.f32 %v1724_v25, %v1728_v31  ;;  %v2058_v25 = vld [vmem:[%s4238_s9 + $0x18] sm:$0xff] }
 0x544   : > { %v2904_v26 = vpack.c.bf16 %v2058_v25, %v2057_v24 }
 0x545   : > { %v1734_v33 = vmul.f32 1.442695, %v1732_v32 }
 0x546   : > { %v1731_v34 = vpop.xlane.xlu1 %1730 }
 0x547   : > { %3059 = vpow2.f32 %v1734_v33  ;;  %v1733_v35 = vsub.f32 %v1725_v30, %v1731_v34  ;;  %v2673_v33 = vld [vmem:[%s4240_s15] ss:$0 sm:$0xff] }
 0x549   : > { %v1736_v36 = vmul.f32 1.442695, %v1733_v35  ;;  %v2674_v35 = vld [vmem:[%s4242_s0] ss:$0 sm:$0xff] }
 0x54a   : > { %v1827_v37 = vpop.permute.xlu1 %1826 }
 0x54b   : > { %3061 = vpow2.f32 %v1736_v36  ;;  %2823 = vmatpush3.msra.mxu1 %v1827_v37 }
 0x54c   : > { %2901 = vmatprep.subr.bf16.mxu1 %v2900_v23 }
 0x551   : > { %v3060_v38 = vpop.eup %3059 }
 0x552   : > { %v1738_v39 = vsel %vm1397_vm4, %v3060_v38, 0.0 }
 0x553   : > { %1739 = vadd.xlane.f32.xlu0 %v1738_v39 }
 0x555   : > { %v3062_v40 = vpop.eup %3061 }
 0x556   : > { %v1741_v41 = vsel %vm1397_vm4, %v3062_v40, 0.0 }
 0x557   : > { %1742 = vadd.xlane.f32.xlu0 %v1741_v41 }
 0x56d   : > { %1749 = vrot.lane.b32.xlu0 %v1232_v4, %s3345_s10 }
 0x5e0   : > { %v1740_v42 = vpop.xlane.xlu0 %1739 }
 0x5e1   : > { %3063 = vrcp.f32 %v1740_v42  ;;  %v2165_v42 = vld [vmem:[%s3835_s4] sm:$0xff] }
 0x5e4   : > { %v1743_v43 = vpop.xlane.xlu0 %1742 }
 0x5e5   : > { %3065 = vrcp.f32 %v1743_v43  ;;  %v2166_v43 = vld [vmem:[%s3835_s4 + $0x8] sm:$0xff] }
 0x5e8   : > { %v1750_v44 = vpop.permute.xlu0 %1749 }
 0x5e9   : > { %2818 = vmatpush3.msra.mxu0 %v1750_v44  ;;  %v2908_v44 = vpack.c.bf16 %v2166_v43, %v2165_v42  ;;  %v2682_v42 = vld [vmem:[%s944_s23] ss:$0 sm:$0xff] }
 0x5ea   : > { %2893 = vmatprep.subr.bf16.mxu0 %v2892_v51 }
 0x5eb   : > { %v3064_v45 = vpop.eup %3063 }
 0x5ec   : > { %v1746_v46 = vmul.f32 %v3064_v45, %v3060_v38  ;;  %v2167_v45 = vld [vmem:[%s3835_s4 + $0x10] sm:$0xff] }
 0x5ee   : > { %2820 = vmatmul.mubr.msk.f32.vlgmr.msra.gmra.mrb[6].mxu0 %vm1397_vm4, %v1746_v46  ;;  %v2168_v46 = vld [vmem:[%s3835_s4 + $0x18] sm:$0xff] }
 0x5ef   : > { %v3066_v47 = vpop.eup %3065  ;;  %2895 = vmatpush3.bf16.msra.mxu0 %v2892_v51  ;;  %v2171_v51 = vld [vmem:[%s3835_s4 + $0x30] sm:$0xff] }
 0x5f0   : > { %v1747_v48 = vmul.f32 %v3066_v47, %v3062_v40  ;;  %2897 = vmatprep.subr.bf16.mxu0 %v2896_v54  ;;  %v2912_v47 = vpack.c.bf16 %v2168_v46, %v2167_v45  ;;  %v2920_v53 = vpack.c.bf16 %v2172_v52, %v2171_v51 }
 0x5f2   : > { %2825 = vmatmul.mubr.msk.f32.vlgmr.msra.gmra.mrb[12].mxu1 %vm1397_vm4, %v1747_v48  ;;  %v2169_v48 = vld [vmem:[%s3835_s4 + $0x20] sm:$0xff] }
 0x5f3   : > { %2899 = vmatpush3.bf16.msra.mxu0 %v2896_v54  ;;  %2903 = vmatpush3.bf16.msra.mxu1 %v2900_v23  ;;  %v2916_v50 = vpack.c.bf16 %v2170_v49, %v2169_v48  ;;  %v2675_v54 = vld [vmem:[%s930_s17] ss:$0 sm:$0xff] }
 0x5f4   : > { %2905 = vmatprep.subr.bf16.mxu1 %v2904_v26  ;;  %2909 = vmatprep.subr.bf16.mxu0 %v2908_v44 }
 0x5f7   : > { %2907 = vmatpush3.bf16.msra.mxu1 %v2904_v26 }
 0x6c1   : > { %v1821_v55 = vpop.f32.mrb[6].mxu0 }
 0x6c2   : > { %1904 = vrot.lane.b32.xlu1 %v1821_v55, %s3346_s8  ;;  %v2821_v56 = vpop.f32.mrb[7].mxu0 }
 0x6c5   : > { %v1898_v57 = vpop.f32.mrb[12].mxu1 }
 0x6c6   : > { %1906 = vrot.lane.b32.xlu1 %v1898_v57, %s3346_s8  ;;  %v2826_v58 = vpop.f32.mrb[13].mxu1 }
 0x734   : > { %v1905_v59 = vpop.permute.xlu1 %1904 }
 0x735   : > { %v1910_v60 = vsel %vm1240_vm3, %v3945_v18, %v1905_v59 }
 0x736   : > { %1912 = vst.msk [vmem:[#allocation3] sm:$0xff] %vm986_vm1, %v1910_v60 }
 0x738   : > { %v1907_v61 = vpop.permute.xlu1 %1906 }
 0x739   : > { %v1911_v62 = vsel %vm1240_vm3, %v3947_v20, %v1907_v61 }
 0x73a   : > { %1913 = vst.msk [vmem:[#allocation3 + $0x8] sm:$0xff] %vm986_vm1, %v1911_v62 }
 0x73d   : > { %v1914_v63 = vld [vmem:[#allocation3] sm:$0xff] }
 0x73e   : > { %2835 = vmatprep.mubr.msk.f32.mxu0 %vm986_vm1, %v1914_v63 }
 0x741   : > { %v1915_v0 = vld [vmem:[#allocation3 + $0x8] sm:$0xff] }
 0x742   : > { %2836 = vmatmul.mubr.msk.f32.vlgmr.msra.gmra.mrb[8].mxu0 %vm986_vm1, %v1915_v0 }
 0x743   : > { %2911 = vmatpush3.bf16.msra.mxu0 %v2908_v44 }
 0x744   : > { %2913 = vmatprep.subr.bf16.mxu0 %v2912_v47 }
 0x747   : > { %2915 = vmatpush3.bf16.msra.mxu0 %v2912_v47 }
 0x748   : > { %2917 = vmatprep.subr.bf16.mxu0 %v2916_v50 }
 0x74b   : > { %2919 = vmatpush3.bf16.msra.mxu0 %v2916_v50 }
 0x74c   : > { %2921 = vmatprep.subr.bf16.mxu0 %v2920_v53 }
 0x74f   : > { %2923 = vmatpush3.bf16.msra.mxu0 %v2920_v53 }
 0x815   : > { %v2837_v2 = vpop.f32.mrb[8].mxu0 }
 0x816   : > { %v2005_v3 = vadd.f32 %v2837_v2, %v2670_v1  ;;  %v1999_v4 = vpop.f32.mrb[9].mxu0 }
 0x817   : > { %v2000_v5 = vadd.f32 %v2670_v1, %v1999_v4 }
 0x818   : > { %v2009_v6 = vadd.f32 %v2005_v3, %v3866_v14 }
 0x819   : > { %v2008_v8 = vadd.f32 %v2000_v5, %v3856_v7 }
 0x81a   : > { %v2015_v9 = vsel %vm986_vm1, %v2009_v6, 0.0 }
 0x81b   : > { %2016 = vadd.xlane.f32.xlu1 %v2015_v9  ;;  %v2012_v10 = vsel %vm986_vm1, %v2008_v8, 0.0 }
 0x81c   : > { %2013 = vadd.xlane.f32.xlu0 %v2012_v10 }
 0x8a8   : > { %v2017_v11 = vpop.xlane.xlu1 %2016 }
 0x8a9   : > { %v2020_v12 = vmul.f32 0.03125, %v2017_v11  ;;  %v2014_v13 = vpop.xlane.xlu0 %2013 }
 0x8aa   : > { %v2019_v15 = vmul.f32 0.03125, %v2014_v13 }
 0x8ab   : > { %v2022_v17 = vsub.f32 %v2009_v6, %v2020_v12 }
 0x8ac   : > { %v2021_v18 = vsub.f32 %v2008_v8, %v2019_v15  ;;  %v2678_v15 = vld [vmem:[%s938_s28] ss:$0 sm:$0xff] }
 0x8ad   : > { %v2024_v7 = vmul.f32 %v2022_v17, %v2022_v17 }
 0x8ae   : > { %v2023_v19 = vmul.f32 %v2021_v18, %v2021_v18 }
 0x8af   : > { %v2028_v20 = vsel %vm986_vm1, %v2024_v7, 0.0 }
 0x8b0   : > { %v2025_v14 = vsel %vm986_vm1, %v2023_v19, 0.0 }
 0x8b1   : > { %2026 = vadd.xlane.f32.xlu0 %v2025_v14 }
 0x8b5   : > { %2029 = vadd.xlane.f32.xlu0 %v2028_v20 }
 0x93e   : > { %v2027_v27 = vpop.xlane.xlu0 %2026 }
 0x93f   : > { %v2031_v28 = vmul.f32 0.03125, %v2027_v27 }
 0x941   : > { %v2033_v29 = vadd.f32 1e-12, %v2031_v28 }
 0x942   : > { %v2030_v30 = vpop.xlane.xlu0 %2029 }
 0x943   : > { %3067 = vrsqrt.f32 %v2033_v29  ;;  %v2032_v16 = vmul.f32 0.03125, %v2030_v30 }
 0x945   : > { %v2034_v31 = vadd.f32 1e-12, %v2032_v16 }
 0x947   : > { %3069 = vrsqrt.f32 %v2034_v31 }
 0x94d   : > { %v3068_v32 = vpop.eup %3067 }
 0x94e   : > { %v2037_v34 = vmul.f32 %v3068_v32, %v2021_v18 }
 0x950   : > { %v2045_v36 = vmul.f32 %v2673_v33, %v2037_v34 }
 0x951   : > { %v3070_v37 = vpop.eup %3069 }
 0x952   : > { %v2038_v38 = vmul.f32 %v3070_v37, %v2022_v17  ;;  %v2053_v39 = vadd.f32 %v2674_v35, %v2045_v36 }
 0x954   : > { %v2046_v40 = vmul.f32 %v2673_v33, %v2038_v38  ;;  %2846 = vmatprep.mubr.msk.f32.mxu1 %vm986_vm1, %v2053_v39 }
 0x956   : > { %v2054_v41 = vadd.f32 %v2674_v35, %v2046_v40 }
 0x958   : > { %2847 = vmatmul.mubr.msk.f32.vlgmr.msra.gmra.mrb[14].mxu1 %vm986_vm1, %v2054_v41 }
 0xa2b   : > { %v2848_v55 = vpop.f32.mrb[14].mxu1 }
 0xa2c   : > { %v2144_v56 = vadd.f32 %v2848_v55, %v2675_v54  ;;  %v2138_v57 = vpop.f32.mrb[15].mxu1 }
 0xa2d   : > { %v2139_v58 = vadd.f32 %v2675_v54, %v2138_v57 }
 0xa2e   : > { %v2150_v59 = vmul.f32 0.044715, %v2144_v56  ;;  %v2148_v11 = vmul.f32 0.5, %v2144_v56 }
 0xa2f   : > { %v2149_v60 = vmul.f32 0.044715, %v2139_v58  ;;  %v2147_v9 = vmul.f32 0.5, %v2139_v58 }
 0xa30   : > { %v2152_v61 = vmul.f32 %v2150_v59, %v2144_v56 }
 0xa31   : > { %v2151_v62 = vmul.f32 %v2149_v60, %v2139_v58 }
 0xa32   : > { %v2154_v63 = vmul.f32 %v2152_v61, %v2144_v56 }
 0xa33   : > { %v2153_v0 = vmul.f32 %v2151_v62, %v2139_v58 }
 0xa34   : > { %v2156_v1 = vadd.f32 %v2154_v63, %v2144_v56 }
 0xa35   : > { %v2155_v2 = vadd.f32 %v2153_v0, %v2139_v58 }
 0xa36   : > { %v2158_v3 = vmul.f32 0.7978846, %v2156_v1 }
 0xa37   : > { %v2157_v4 = vmul.f32 0.7978846, %v2155_v2 }
 0xa38   : > { %3071 = vtanh.f32 %v2158_v3 }
 0xa39   : > { %3073 = vtanh.f32 %v2157_v4 }
 0xa42   : > { %v3072_v5 = vpop.eup %3071 }
 0xa43   : > { %v3074_v6 = vpop.eup %3073  ;;  %v2162_v8 = vadd.f32 1.0, %v3072_v5 }
 0xa44   : > { %v2161_v10 = vadd.f32 1.0, %v3074_v6 }
 0xa45   : > { %v2164_v13 = vmul.f32 %v2162_v8, %v2148_v11 }
 0xa46   : > { %v2163_v12 = vmul.f32 %v2161_v10, %v2147_v9 }
 0xa48   : > { %2865 = vmatprep.mubr.msk.f32.mxu0 %vm2180_vm5, %v2163_v12 }
 0xa49   : > { %2866 = vmatmul.mubr.msk.f32.vlgmr.msra.gmra.mrb[10].mxu0 %vm2180_vm5, %v2164_v13 }
 0xb1c   : > { %v2867_v17 = vpop.f32.mrb[10].mxu0 }
 0xb1d   : > { %v2259_v18 = vadd.f32 %v2867_v17, %v2678_v15  ;;  %v2253_v19 = vpop.f32.mrb[11].mxu0 }
 0xb1e   : > { %v2254_v14 = vadd.f32 %v2678_v15, %v2253_v19 }
 0xb1f   : > { %v2263_v7 = vadd.f32 %v2259_v18, %v2054_v41 }
 0xb20   : > { %v2262_v20 = vadd.f32 %v2254_v14, %v2053_v39  ;;  %v2681_v39 = vld [vmem:[%s941_s2] ss:$0 sm:$0xff] }
 0xb21   : > { %v2269_v21 = vsel %vm986_vm1, %v2263_v7, 0.0 }
 0xb22   : > { %2270 = vadd.xlane.f32.xlu1 %v2269_v21  ;;  %v2266_v22 = vsel %vm986_vm1, %v2262_v20, 0.0 }
 0xb23   : > { %2267 = vadd.xlane.f32.xlu0 %v2266_v22 }
 0xbaf   : > { %v2271_v23 = vpop.xlane.xlu1 %2270 }
 0xbb0   : > { %v2273_v24 = vmul.f32 0.03125, %v2271_v23  ;;  %v2268_v25 = vpop.xlane.xlu0 %2267 }
 0xbb1   : > { %v2272_v26 = vmul.f32 0.03125, %v2268_v25 }
 0xbb2   : > { %v2275_v27 = vsub.f32 %v2263_v7, %v2273_v24 }
 0xbb3   : > { %v2274_v28 = vsub.f32 %v2262_v20, %v2272_v26 }
 0xbb4   : > { %v2277_v29 = vmul.f32 %v2275_v27, %v2275_v27 }
 0xbb5   : > { %v2276_v30 = vmul.f32 %v2274_v28, %v2274_v28 }
 0xbb6   : > { %v2281_v16 = vsel %vm986_vm1, %v2277_v29, 0.0 }
 0xbb7   : > { %2282 = vadd.xlane.f32.xlu1 %v2281_v16  ;;  %v2278_v31 = vsel %vm986_vm1, %v2276_v30, 0.0 }
 0xbb8   : > { %2279 = vadd.xlane.f32.xlu0 %v2278_v31 }
 0xc44   : > { %v2283_v32 = vpop.xlane.xlu1 %2282 }
 0xc45   : > { %v2285_v33 = vmul.f32 0.03125, %v2283_v32  ;;  %v2280_v34 = vpop.xlane.xlu0 %2279 }
 0xc46   : > { %v2284_v35 = vmul.f32 0.03125, %v2280_v34 }
 0xc47   : > { %v2287_v36 = vadd.f32 1e-12, %v2285_v33 }
 0xc48   : > { %v2286_v37 = vadd.f32 1e-12, %v2284_v35 }
 0xc49   : > { %3075 = vrsqrt.f32 %v2287_v36 }
 0xc4a   : > { %3077 = vrsqrt.f32 %v2286_v37 }
 0xc53   : > { %v3076_v38 = vpop.eup %3075 }
 0xc54   : > { %v3078_v40 = vpop.eup %3077  ;;  %v2291_v41 = vmul.f32 %v3076_v38, %v2275_v27 }
 0xc55   : > { %v2290_v43 = vmul.f32 %v3078_v40, %v2274_v28  ;;  %2313 = sbr.rel (%p2683_p5) target bundleno = 3164 (0xc5c), region = 116 }
 0xc56   : > { %v2299_v44 = vmul.f32 %v2681_v39, %v2291_v41 }
 0xc57   : > { %v2298_v45 = vmul.f32 %v2681_v39, %v2290_v43 }
 0xc58   : > { %v2307_v46 = vadd.f32 %v2682_v42, %v2299_v44 }
 0xc59   : > { %v2306_v47 = vadd.f32 %v2682_v42, %v2298_v45 }
 0xc5a   : > { %2309 = vst.msk [vmem:[#allocation2 + $0x8] sm:$0xff] %vm986_vm1, %v2307_v46  ;;  %2315 = vst.msk [vmem:[%s3851_s19 + $0x8] sm:$0xff] (!%p2683_p5), %vm986_vm1, %v2307_v46 }
 0xc5b   : > { %2308 = vst.msk [vmem:[#allocation2] sm:$0xff] %vm986_vm1, %v2306_v47  ;;  %2314 = vst.msk [vmem:[%s3851_s19] sm:$0xff] (!%p2683_p5), %vm986_vm1, %v2306_v47 }
 0xc5c PF: > { %s4247_s2 = sld [smem:[#allocation23_spill]]  ;;  %s4248_s18 = sld [smem:[#allocation27_spill]] }
 0xc5d   : > { %s4249_s14 = sld [smem:[#allocation52_spill]]  ;;  %s2330_s30 = sshll.u32 %s3851_s19, 4  ;;  %s4044_s30 = int_to_ptr.vmem [resolvable:$true] %s2330_s30 }
 0xc5e   : > { %s2317_s1 = scalar_lea.sflag [#allocation6], %s3752_s25  ;;  %s3199_s12 = scalar_lea.vmem %s4044_s30, 256 }
 0xc5f   : > { %p3200_p0 = scmp.ne.s32.totalorder %s4044_s30, %s3199_s12  ;;  %s3347_s21 = smov [#allocation12]  }
 0xc60   : > { %s3203_s15 = sshll.u32 %s3347_s21, 4  ;;  %s3204_s15 = int_to_ptr.vmem [resolvable:$false] %s3203_s15 }
 0xc61   : > { %s3205_s6 = scalar_lea.vmem %s3204_s15, 512  ;;  %p3206_p8 = scmp.lt.s32.totalorder %s4044_s30, %s3204_s15 }
 0xc62   : > { %s2697_s23 = sshll.u32 %s4247_s2, 8  ;;  %p4250_p7 = scmp.ne.s32.totalorder %s4248_s18, 0 }
 0xc63   : > { %s4041_s9 = scalar_lea.hbm %s4249_s14, %s2697_s23  ;;  %p3207_p4 = scmp.lt.s32.totalorder %s3205_s6, %s3199_s12 }
 0xc64   : > { %p3201_p3 = pnand %p3200_p0, %p4250_p7 }
 0xc65   : > { %p3208_p10 = por %p3207_p4, %p3206_p8 }
 0xc66   : > { %p3202_p11 = pneg %p3201_p3 }
 0xc68   : > { %p3209_p9 = pnand %p3208_p10, %p3202_p11 }
 0xc6a   : > { %3212 = shalt.err (!%p3209_p9)
}
 0xc6b   : > { %s3213_s19 = scalar_lea.hbm %s4041_s9, 256  ;;  %s3217_s0 = scalar_lea.hbm %s4249_s14, 512 }
 0xc6c   : > { %p3214_p13 = scmp.ne.s32.totalorder %s4041_s9, %s3213_s19  ;;  %p3218_p2 = scmp.lt.u32.totalorder %s4041_s9, %s4249_s14 }
 0xc6d   : > { %p3219_p1 = scmp.lt.u32.totalorder %s3217_s0, %s3213_s19  ;;  %p3221_p0 = scmp.lt.u32.totalorder %s3213_s19, %s4041_s9 }
 0xc6e   : > { %p3215_p6 = pnand %p3214_p13, %p4250_p7 }
 0xc6f   : > { %p3220_p5 = por %p3219_p1, %p3218_p2 }
 0xc70   : > { %p3216_p12 = pneg %p3215_p6 }
 0xc71   : > { %p3222_p3 = por %p3221_p0, %p3220_p5 }
 0xc73   : > { %p3223_p11 = pnand %p3222_p3, %p3216_p12 }
 0xc75   : > { %3226 = shalt.err (!%p3223_p11)
}
 0xc76   : > { %s3348_s10 = smov 128   ;;  %s3349_s17 = smov 8  }
 0xc77   : > { %2932 = dma.vmem_to_hbm [thread:$0]  (%p4250_p7), %s4044_s30, 256, %s4041_s9, %s2317_s1, %s3348_s10, %s3348_s10, %s3349_s17  }
 0xc78 PF: > { %s4251_s4 = sld [smem:[#allocation26_spill]]  ;;  %s4252_s27 = sld [smem:[#allocation20_spill]] }
 0xc79   : > { %s4253_s28 = sld [smem:[#allocation28_spill]] }
 0xc7e   : > { %p2952_p8 = scmp.ge.s32.totalorder %s4251_s4, 2  ;;  %s2345_s22 = sand.u32 1, %s4252_s27  }
 0xc7f   : > { %p4254_p4 = scmp.ne.s32.totalorder %s4253_s28, 0  ;;  %s2346_s13 = scalar_lea.sflag [#allocation6], %s2345_s22 }
 0xc81   : > { %p2948_p10 = pnand %p2952_p8, %p4254_p4 }
 0xc83   : > { %3288 = dma.done.wait (!%p2948_p10), %s2346_s13, 256  }
 0xc84   : > { %3290 = vsyncadd (!%p2948_p10), %s2346_s13, 4294967040  ;;  %s40_s2 = sadd.s32 1, %s4251_s4   ;;  %s4255_s27 = sld [smem:[#allocation18_spill]] }
 0xc85   : > { %p37_p9 = scmp.ge.s32.totalorder %s40_s2, 6   ;;  %s4256_s28 = sld [smem:[#allocation19_spill]] }
 0xc86   : > { %s4257_s29 = sld [smem:[#allocation31_spill]]  ;;  %s4258_s30 = sld [smem:[#allocation21_spill]] }
 0xc87   : > { %s4259_s0 = sld [smem:[#allocation22_spill]]  ;;  %s4260_s19 = sld [smem:[#allocation32_spill]] }
 0xc88   : > { %s4261_s1 = sld [smem:[#allocation24_spill]]  ;;  %s4262_s20 = sld [smem:[#allocation25_spill]] }
 0xc89   : > { %s4263_s21 = sld [smem:[#allocation29_spill]]  ;;  %s4264_s22 = sld [smem:[#allocation30_spill]] }
 0xc8a   :  { %39 = sbr.rel (!%p37_p9) target bundleno = 32 (0x20), region = 224 }
 0xc91   :  { %2351 = vsyncpa [#allocation5], 1 }
 0xc92   :  { %2353 = vsyncpa [#allocation5 + $0x1], 1 }
 0xc93   :  { %2354 = vsyncpa [#allocation8], 1 }
 0xc94   :  { %2356 = vsyncpa [#allocation8 + $0x1], 1 }
 0xc95   :  { %2357 = vsyncpa [#allocation11], 1 }
 0xc96   :  { %2359 = vsyncpa [#allocation11 + $0x1], 1 }
 0xc97   :  { %2360 = vsyncpa [#allocation6], 1 }
 0xc98   :  { %2362 = vsyncpa [#allocation6 + $0x1], 1 }

</bundles_post_ra>
